<compile_context>
chip_gen: v6e
topology: v6e:2x2x1
jax: 0.10.0
libtpu: 0.0.40
codegen_flags: <defaults>
</compile_context>

<pallas_src>
import jax
import jax.numpy as jnp
from jax.experimental import pallas as pl
from jax.experimental.pallas import tpu as pltpu


# ---------------------------------------------------------------------------
# in-kernel helpers
# ---------------------------------------------------------------------------
def _normalize(v):
    """-nan_to_num(v, neginf=-3) / 3, clipped to [0, 1] (elementwise)."""
    v = jnp.where(v != v, 0.0, v)            # NaN -> 0
    v = jnp.where(v == -jnp.inf, -3.0, v)    # -inf -> -3 (+inf clips to 0 below)
    return jnp.clip(-v * (1.0 / 3.0), 0.0, 1.0)


def _leaky(v):
    return jnp.where(v >= 0.0, v, 0.01 * v)


def _elu(v):
    return jnp.where(v > 0.0, v, jnp.exp(jnp.minimum(v, 0.0)) - 1.0)


# ---------------------------------------------------------------------------
# Pallas kernels
# ---------------------------------------------------------------------------
def _conv1_pool_kernel(p_ref, w_ref, b_ref, o_ref):
    """normalize + conv1 + bias + 2x2 maxpool + LeakyReLU, channel-major.

    p_ref: (4, K1, M)  conv1 patches (transposed), grouped by pool position;
                       M = T*B*Hp*Wp pooled output pixels (lane axis).
    w_ref: (C1, K1)    conv1 weight (transposed).   b_ref: (C1, 1).
    o_ref: (C1, M)
    """
    w = w_ref[...]
    acc = None
    for q in range(4):                       # static unroll: 4 pool positions
        yq = jnp.dot(w, _normalize(p_ref[q]),
                     preferred_element_type=jnp.float32)
        acc = yq if acc is None else jnp.maximum(acc, yq)
    o_ref[...] = _leaky(acc + b_ref[...])


def _conv2_kernel(p_ref, w_ref, b_ref, o_ref):
    """conv2 + bias + LeakyReLU, channel-major: (C2, M2) = W2^T @ patches^T."""
    y = jnp.dot(w_ref[...], p_ref[...], preferred_element_type=jnp.float32)
    o_ref[...] = _leaky(y + b_ref[...])


def _gru_head_kernel(x3_ref, bsfp_ref, w3_ref, b3_ref, wia_ref, wib_ref,
                     wh_ref, bi_ref, bh_ref, wf1, bf1, wf2, bf2, wf3, bf3,
                     wf4, bf4, o_ref, h_scr):
    """Per time step: conv3 (1x1 spatial -> linear) + GRU cell + 4-layer MLP."""
    t = pl.program_id(0)

    @pl.when(t == 0)
    def _():
        h_scr[...] = jnp.zeros_like(h_scr)

    hh = h_scr.shape[1]

    def mm(a, w):
        return jnp.dot(a, w[...], preferred_element_type=jnp.float32)

    x3 = x3_ref[0]                    # (Bp, 36)  conv2 features per image
    bsfp = bsfp_ref[0]                # (Bp, 16)  [base_state | foot_positions]
    h = h_scr[...]                    # (Bp, H)

    # conv3: 3x3 kernel over a 3x3 map -> single output pixel == linear layer
    emb = _leaky(mm(x3, w3_ref) + b3_ref[...])                # (Bp, 8)

    # concatenated GRU gates, columns [ r | z | n ]
    gi = mm(bsfp, wia_ref) + mm(emb, wib_ref) + bi_ref[...]   # (Bp, 3H)
    gh = mm(h, wh_ref) + bh_ref[...]                          # (Bp, 3H)

    r = jax.nn.sigmoid(gi[:, 0:hh] + gh[:, 0:hh])
    z = jax.nn.sigmoid(gi[:, hh:2 * hh] + gh[:, hh:2 * hh])
    n = jnp.tanh(gi[:, 2 * hh:3 * hh] + r * gh[:, 2 * hh:3 * hh])
    h_new = (1.0 - z) * n + z * h
    h_scr[...] = h_new

    # fused MLP head on the fresh hidden state
    m = _elu(mm(h_new, wf1) + bf1[...])
    m = _elu(mm(m, wf2) + bf2[...])
    m = _elu(mm(m, wf3) + bf3[...])
    o_ref[0] = mm(m, wf4) + bf4[...]


# ---------------------------------------------------------------------------
# Full forward pass (3 pallas_calls + XLA data-movement glue)
# ---------------------------------------------------------------------------
def pallas_forward(params, base_state, foot_positions, depth_image):
    t_len, bsz, img_h, img_w = depth_image.shape
    tb = t_len * bsz
    x = depth_image.reshape(tb, img_h, img_w)

    # geometry (matches Conv2dModel defaults: 5/4/3 kernels, maxpool(2))
    hc1, wc1 = img_h - 4, img_w - 4          # conv1 5x5 valid
    hp1, wp1 = hc1 // 2, wc1 // 2            # MaxPool2d(2)
    hc2, wc2 = hp1 - 3, wp1 - 3              # conv2 4x4 valid
    # TODO(synk): add a standalone channel-major conv3 kernel for resolutions
    # where the conv3 output is not 1x1 (e.g. the 48x64 default) instead of
    # folding conv3 into the GRU kernel.
    assert hc2 == 3 and wc2 == 3, "fused conv3 path assumes a 1x1 conv3 output"

    # ---- kernel A: normalize + conv1 + 2x2 maxpool + LeakyReLU -------------
    # conv1 patches (transposed, K-major rows), grouped by pool window position
    cols = jnp.stack([x[:, kh:kh + hc1, kw:kw + wc1]
                      for kh in range(5) for kw in range(5)], axis=0)
    quads = jnp.stack([cols[:, :, di::2, dj::2][:, :, :hp1, :wp1]
                       for di in (0, 1) for dj in (0, 1)], axis=0)
    p1 = quads.reshape(4, 25, tb * hp1 * wp1)

    w1t = params["conv1_w"].reshape(25, 2).T          # (C1, K1)
    b1c = params["conv1_b"].reshape(2, 1)
    pooled = pl.pallas_call(
        _conv1_pool_kernel,
        out_shape=jax.ShapeDtypeStruct((2, tb * hp1 * wp1), jnp.float32),
    )(p1, w1t, b1c)                                   # (C1, tb*hp1*wp1)

    # ---- kernel B: conv2 + LeakyReLU ----------------------------------------
    pool_nhwc = pooled.reshape(2, tb, hp1, wp1).transpose(1, 2, 3, 0)
    p2c = jnp.stack([pool_nhwc[:, kh:kh + hc2, kw:kw + wc2, :]
                     for kh in range(4) for kw in range(4)], axis=0)
    p2t = p2c.transpose(0, 4, 1, 2, 3).reshape(32, tb * hc2 * wc2)

    w2t = params["conv2_w"].reshape(32, 4).T          # (C2, K2)
    b2c = params["conv2_b"].reshape(4, 1)
    y2 = pl.pallas_call(
        _conv2_kernel,
        out_shape=jax.ShapeDtypeStruct((4, tb * hc2 * wc2), jnp.float32),
    )(p2t, w2t, b2c)                                  # (C2, tb*hc2*wc2)

    # ---- kernel C: conv3 + GRU + MLP head (grid over time) ------------------
    # conv3 input per image: the full 3x3x4 conv2 map, feature order (h, w, c)
    din3 = hc2 * wc2 * 4
    x3 = (y2.reshape(4, t_len, bsz, hc2, wc2)
             .transpose(1, 2, 3, 4, 0)
             .reshape(t_len, bsz, din3))
    bsfp = jnp.concatenate([base_state, foot_positions], axis=-1)  # (T, B, 16)

    b_pad = ((bsz + 7) // 8) * 8                      # full-sublane batch
    pad = ((0, 0), (0, b_pad - bsz), (0, 0))
    x3p = jnp.pad(x3, pad)
    bsfpp = jnp.pad(bsfp, pad)

    w3r = params["conv3_w"].reshape(din3, 8)
    b3r = params["conv3_b"].reshape(1, 8)

    hh = params["gru_w_hr"].shape[0]
    wi = jnp.concatenate([params["gru_w_ir"], params["gru_w_iz"],
                          params["gru_w_in"]], axis=1)            # (Din, 3H)
    wia, wib = wi[:16], wi[16:]                                   # bsfp / emb rows
    whc = jnp.concatenate([params["gru_w_hr"], params["gru_w_hz"],
                           params["gru_w_hn"]], axis=1)           # (H, 3H)
    bi = jnp.concatenate([params["gru_b_ir"], params["gru_b_iz"],
                          params["gru_b_in"]]).reshape(1, 3 * hh)
    bh = jnp.concatenate([params["gru_b_hr"], params["gru_b_hz"],
                          params["gru_b_hn"]]).reshape(1, 3 * hh)

    fc = []
    for i in (1, 2, 3, 4):
        fc.append(params[f"fc{i}_w"])
        fc.append(params[f"fc{i}_b"].reshape(1, -1))
    dout = params["fc4_w"].shape[1]

    weights = [w3r, b3r, wia, wib, whc, bi, bh] + fc

    def full_spec(shape):
        return pl.BlockSpec(shape, lambda t: (0,) * len(shape))

    in_specs = ([pl.BlockSpec((1, b_pad, din3), lambda t: (t, 0, 0)),
                 pl.BlockSpec((1, b_pad, 16), lambda t: (t, 0, 0))]
                + [full_spec(wgt.shape) for wgt in weights])

    grid_spec = pltpu.PrefetchScalarGridSpec(
        num_scalar_prefetch=0,
        grid=(t_len,),
        in_specs=in_specs,
        out_specs=pl.BlockSpec((1, b_pad, dout), lambda t: (t, 0, 0)),
        scratch_shapes=[pltpu.VMEM((b_pad, hh), jnp.float32)],
    )
    out = pl.pallas_call(
        _gru_head_kernel,
        out_shape=jax.ShapeDtypeStruct((t_len, b_pad, dout), jnp.float32),
        grid_spec=grid_spec,
        compiler_params=pltpu.CompilerParams(dimension_semantics=("arbitrary",)),
    )(x3p, bsfpp, *weights)
    return out[:, :bsz]


# ---------------------------------------------------------------------------
# Pure-JAX reference (same parameter layout) used only as a sanity check
# ---------------------------------------------------------------------------
def _im2col(x, kh, kw):
    n, h, w, c = x.shape
    ho, wo = h - kh + 1, w - kw + 1
    cols = [x[:, i:i + ho, j:j + wo, :] for i in range(kh) for j in range(kw)]
    patches = jnp.concatenate(cols, axis=-1)          # (n, ho, wo, kh*kw*c)
    return patches.reshape(n * ho * wo, kh * kw * c), (n, ho, wo)


def _pool_windows(y):
    n, h, w, c = y.shape
    hp, wp = h // 2, w // 2
    wins = [y[:, di:di + 2 * hp:2, dj:dj + 2 * wp:2, :].reshape(n * hp * wp, c)
            for di in (0, 1) for dj in (0, 1)]
    return jnp.stack(wins, axis=0), (n, hp, wp)


def reference_forward(params, base_state, foot_positions, depth_image):
    t_len, b, h, w = depth_image.shape
    tb = t_len * b
    x = jnp.where(jnp.isnan(depth_image), 0.0, depth_image)
    x = jnp.where(jnp.isneginf(x), -3.0, x)
    x = jnp.clip(-x / 3.0, 0.0, 1.0)
    img = x.reshape(tb, h, w, 1)

    def leaky(v):
        return jnp.where(v >= 0.0, v, 0.01 * v)

    def conv(inp, wgt, bias, k):
        p, (n, ho, wo) = _im2col(inp, k, k)
        cout = wgt.shape[-1]
        y = leaky(p @ wgt.reshape(-1, cout) + bias)
        return y.reshape(n, ho, wo, cout)

    y1 = conv(img, params["conv1_w"], params["conv1_b"], 5)
    wins, (n, hp, wp) = _pool_windows(y1)
    yp = jnp.max(wins, axis=0).reshape(n, hp, wp, 2)
    y2 = conv(yp, params["conv2_w"], params["conv2_b"], 4)
    y3 = conv(y2, params["conv3_w"], params["conv3_b"], 3)
    depth_emb = y3.reshape(t_len, b, -1)

    curr = jnp.concatenate([base_state, foot_positions, depth_emb], axis=-1)

    hh = params["gru_w_hr"].shape[0]
    hstate = jnp.zeros((b, hh), jnp.float32)
    outs = []
    for t in range(t_len):
        xt = curr[t]
        r = jax.nn.sigmoid(xt @ params["gru_w_ir"] + params["gru_b_ir"]
                           + hstate @ params["gru_w_hr"] + params["gru_b_hr"])
        z = jax.nn.sigmoid(xt @ params["gru_w_iz"] + params["gru_b_iz"]
                           + hstate @ params["gru_w_hz"] + params["gru_b_hz"])
        nn = jnp.tanh(xt @ params["gru_w_in"] + params["gru_b_in"]
                      + r * (hstate @ params["gru_w_hn"] + params["gru_b_hn"]))
        hstate = (1.0 - z) * nn + z * hstate
        outs.append(hstate)
    rnn_out = jnp.stack(outs, axis=0)

    def elu(v):
        return jnp.where(v > 0.0, v, jnp.exp(jnp.minimum(v, 0.0)) - 1.0)

    cur = rnn_out.reshape(tb, hh)
    cur = elu(cur @ params["fc1_w"] + params["fc1_b"])
    cur = elu(cur @ params["fc2_w"] + params["fc2_b"])
    cur = elu(cur @ params["fc3_w"] + params["fc3_b"])
    out = cur @ params["fc4_w"] + params["fc4_b"]
    return out.reshape(t_len, b, -1)


# ---------------------------------------------------------------------------
# Deterministic synthetic parameter initialization
# ---------------------------------------------------------------------------
def init_params(key, img_h, img_w, rnn_hidden=32, dim_hidden=32, dim_output=20):
    # conv_out_size replica for the default Conv2dModel config
    h, w = img_h - 4, img_w - 4                   # 5x5 conv, stride 1, valid
    h, w = (h - 2) // 2 + 1, (w - 2) // 2 + 1     # MaxPool2d(2)
    h, w = h - 3, w - 3                           # 4x4 conv
    h, w = h - 2, w - 2                           # 3x3 conv
    dim_embedding = h * w * 8
    din_rnn = dim_embedding + 8 + 8               # + base_state + foot_positions

    keys = iter(jax.random.split(key, 64))

    def uni(shape, fan_in):
        bound = 1.0 / float(fan_in) ** 0.5
        return jax.random.uniform(next(keys), shape, jnp.float32, -bound, bound)

    p = {
        "conv1_w": uni((5, 5, 1, 2), 25), "conv1_b": uni((2,), 25),
        "conv2_w": uni((4, 4, 2, 4), 32), "conv2_b": uni((4,), 32),
        "conv3_w": uni((3, 3, 4, 8), 36), "conv3_b": uni((8,), 36),
    }
    for g in ("r", "z", "n"):
        p[f"gru_w_i{g}"] = uni((din_rnn, rnn_hidden), rnn_hidden)
        p[f"gru_w_h{g}"] = uni((rnn_hidden, rnn_hidden), rnn_hidden)
        p[f"gru_b_i{g}"] = uni((rnn_hidden,), rnn_hidden)
        p[f"gru_b_h{g}"] = uni((rnn_hidden,), rnn_hidden)
    dims = [rnn_hidden, dim_hidden, dim_hidden, dim_hidden, dim_output]
    for i in range(4):
        p[f"fc{i + 1}_w"] = uni((dims[i], dims[i + 1]), dims[i])
        p[f"fc{i + 1}_b"] = uni((dims[i + 1],), dims[i])
    return p


if __name__ == "__main__":
    key = jax.random.PRNGKey(0)
    k_par, k_bs, k_fp, k_img = jax.random.split(key, 4)

    T, B = 4, 3                       # (seq, batch) -- 3D input path of Memory
    V_RES, H_RES = 16, 16             # small vertical_res / horizontal_res
    RNN_HIDDEN, DIM_HIDDEN, DIM_OUTPUT = 32, 32, 20

    params = init_params(k_par, V_RES, H_RES, RNN_HIDDEN, DIM_HIDDEN, DIM_OUTPUT)

    base_state = jax.random.normal(k_bs, (T, B, 8), jnp.float32)
    foot_positions = jax.random.normal(k_fp, (T, B, 8), jnp.float32)
    depth_image = -3.0 * jax.random.uniform(k_img, (T, B, V_RES, H_RES), jnp.float32)
    # exercise the nan_to_num / neginf handling
    depth_image = depth_image.at[0, 0, 0, 0].set(jnp.nan)
    depth_image = depth_image.at[0, 0, 0, 1].set(-jnp.inf)

    fwd = jax.jit(pallas_forward)
    out = fwd(params, base_state, foot_positions, depth_image)
    out = jax.block_until_ready(out)

    ref = reference_forward(params, base_state, foot_positions, depth_image)
    assert out.shape == (T, B, DIM_OUTPUT), out.shape
    assert out.dtype == jnp.float32
    if not jnp.allclose(out, ref, atol=2e-3, rtol=2e-3):
        raise AssertionError("Pallas forward does not match JAX reference")
    print("KERNEL_OK")
</pallas_src>

<mosaic_0001>
module attributes {stable_mosaic.version = 11 : i64} {
  func.func @_conv1_pool_kernel(%arg0: memref<4x25x432xf32, #tpu.memory_space<vmem>>, %arg1: memref<2x25xf32, #tpu.memory_space<vmem>>, %arg2: memref<2x1xf32, #tpu.memory_space<vmem>>, %arg3: memref<2x432xf32, #tpu.memory_space<vmem>>) attributes {dimension_semantics = [], scalar_prefetch = 0 : i64, scratch_operands = 0 : i64, tpu.core_type = #tpu.core_type<tc>} {
    %c0 = arith.constant 0 : index
    %c0_0 = arith.constant 0 : index
    %0 = vector.load %arg1[%c0, %c0_0] : memref<2x25xf32, #tpu.memory_space<vmem>>, vector<2x25xf32>
    %c0_1 = arith.constant 0 : index
    %c0_2 = arith.constant 0 : index
    %c0_3 = arith.constant 0 : index
    %1 = vector.load %arg0[%c0_1, %c0_2, %c0_3] : memref<4x25x432xf32, #tpu.memory_space<vmem>>, vector<1x25x432xf32>
    %2 = vector.shape_cast %1 : vector<1x25x432xf32> to vector<25x432xf32>
    %3 = arith.cmpf one, %2, %2 : vector<25x432xf32>
    %cst = arith.constant 0.000000e+00 : f32
    %4 = vector.broadcast %cst : f32 to vector<25x432xf32>
    %5 = arith.select %3, %4, %2 : vector<25x432xi1>, vector<25x432xf32>
    %cst_4 = arith.constant 0xFF800000 : f32
    %6 = vector.broadcast %cst_4 : f32 to vector<25x432xf32>
    %7 = arith.cmpf oeq, %5, %6 : vector<25x432xf32>
    %cst_5 = arith.constant -3.000000e+00 : f32
    %8 = vector.broadcast %cst_5 : f32 to vector<25x432xf32>
    %9 = arith.select %7, %8, %5 : vector<25x432xi1>, vector<25x432xf32>
    %cst_6 = arith.constant 0.000000e+00 : f32
    %10 = vector.broadcast %cst_6 : f32 to vector<25x432xf32>
    %11 = arith.subf %10, %9 : vector<25x432xf32>
    %cst_7 = arith.constant 0.333333343 : f32
    %12 = vector.broadcast %cst_7 : f32 to vector<25x432xf32>
    %13 = arith.mulf %11, %12 : vector<25x432xf32>
    %cst_8 = arith.constant 0.000000e+00 : f32
    %cst_9 = arith.constant 1.000000e+00 : f32
    %14 = vector.broadcast %cst_8 : f32 to vector<25x432xf32>
    %15 = arith.maximumf %14, %13 : vector<25x432xf32>
    %16 = vector.broadcast %cst_9 : f32 to vector<25x432xf32>
    %17 = arith.minimumf %16, %15 : vector<25x432xf32>
    %cst_10 = arith.constant dense<0.000000e+00> : vector<2x432xf32>
    %18 = tpu.matmul %0, %17, %cst_10 {dimension_numbers = #tpu.dot_dimension_numbers<[1], [0], [0], [1], [0, 0, 1, 1], [], []>} : vector<2x25xf32>, vector<25x432xf32>, vector<2x432xf32> -> vector<2x432xf32>
    %c1 = arith.constant 1 : index
    %c0_11 = arith.constant 0 : index
    %c0_12 = arith.constant 0 : index
    %19 = vector.load %arg0[%c1, %c0_11, %c0_12] : memref<4x25x432xf32, #tpu.memory_space<vmem>>, vector<1x25x432xf32>
    %20 = vector.shape_cast %19 : vector<1x25x432xf32> to vector<25x432xf32>
    %21 = arith.cmpf one, %20, %20 : vector<25x432xf32>
    %cst_13 = arith.constant 0.000000e+00 : f32
    %22 = vector.broadcast %cst_13 : f32 to vector<25x432xf32>
    %23 = arith.select %21, %22, %20 : vector<25x432xi1>, vector<25x432xf32>
    %cst_14 = arith.constant 0xFF800000 : f32
    %24 = vector.broadcast %cst_14 : f32 to vector<25x432xf32>
    %25 = arith.cmpf oeq, %23, %24 : vector<25x432xf32>
    %cst_15 = arith.constant -3.000000e+00 : f32
    %26 = vector.broadcast %cst_15 : f32 to vector<25x432xf32>
    %27 = arith.select %25, %26, %23 : vector<25x432xi1>, vector<25x432xf32>
    %cst_16 = arith.constant 0.000000e+00 : f32
    %28 = vector.broadcast %cst_16 : f32 to vector<25x432xf32>
    %29 = arith.subf %28, %27 : vector<25x432xf32>
    %cst_17 = arith.constant 0.333333343 : f32
    %30 = vector.broadcast %cst_17 : f32 to vector<25x432xf32>
    %31 = arith.mulf %29, %30 : vector<25x432xf32>
    %cst_18 = arith.constant 0.000000e+00 : f32
    %cst_19 = arith.constant 1.000000e+00 : f32
    %32 = vector.broadcast %cst_18 : f32 to vector<25x432xf32>
    %33 = arith.maximumf %32, %31 : vector<25x432xf32>
    %34 = vector.broadcast %cst_19 : f32 to vector<25x432xf32>
    %35 = arith.minimumf %34, %33 : vector<25x432xf32>
    %cst_20 = arith.constant dense<0.000000e+00> : vector<2x432xf32>
    %36 = tpu.matmul %0, %35, %cst_20 {dimension_numbers = #tpu.dot_dimension_numbers<[1], [0], [0], [1], [0, 0, 1, 1], [], []>} : vector<2x25xf32>, vector<25x432xf32>, vector<2x432xf32> -> vector<2x432xf32>
    %37 = arith.maximumf %18, %36 : vector<2x432xf32>
    %c2 = arith.constant 2 : index
    %c0_21 = arith.constant 0 : index
    %c0_22 = arith.constant 0 : index
    %38 = vector.load %arg0[%c2, %c0_21, %c0_22] : memref<4x25x432xf32, #tpu.memory_space<vmem>>, vector<1x25x432xf32>
    %39 = vector.shape_cast %38 : vector<1x25x432xf32> to vector<25x432xf32>
    %40 = arith.cmpf one, %39, %39 : vector<25x432xf32>
    %cst_23 = arith.constant 0.000000e+00 : f32
    %41 = vector.broadcast %cst_23 : f32 to vector<25x432xf32>
    %42 = arith.select %40, %41, %39 : vector<25x432xi1>, vector<25x432xf32>
    %cst_24 = arith.constant 0xFF800000 : f32
    %43 = vector.broadcast %cst_24 : f32 to vector<25x432xf32>
    %44 = arith.cmpf oeq, %42, %43 : vector<25x432xf32>
    %cst_25 = arith.constant -3.000000e+00 : f32
    %45 = vector.broadcast %cst_25 : f32 to vector<25x432xf32>
    %46 = arith.select %44, %45, %42 : vector<25x432xi1>, vector<25x432xf32>
    %cst_26 = arith.constant 0.000000e+00 : f32
    %47 = vector.broadcast %cst_26 : f32 to vector<25x432xf32>
    %48 = arith.subf %47, %46 : vector<25x432xf32>
    %cst_27 = arith.constant 0.333333343 : f32
    %49 = vector.broadcast %cst_27 : f32 to vector<25x432xf32>
    %50 = arith.mulf %48, %49 : vector<25x432xf32>
    %cst_28 = arith.constant 0.000000e+00 : f32
    %cst_29 = arith.constant 1.000000e+00 : f32
    %51 = vector.broadcast %cst_28 : f32 to vector<25x432xf32>
    %52 = arith.maximumf %51, %50 : vector<25x432xf32>
    %53 = vector.broadcast %cst_29 : f32 to vector<25x432xf32>
    %54 = arith.minimumf %53, %52 : vector<25x432xf32>
    %cst_30 = arith.constant dense<0.000000e+00> : vector<2x432xf32>
    %55 = tpu.matmul %0, %54, %cst_30 {dimension_numbers = #tpu.dot_dimension_numbers<[1], [0], [0], [1], [0, 0, 1, 1], [], []>} : vector<2x25xf32>, vector<25x432xf32>, vector<2x432xf32> -> vector<2x432xf32>
    %56 = arith.maximumf %37, %55 : vector<2x432xf32>
    %c3 = arith.constant 3 : index
    %c0_31 = arith.constant 0 : index
    %c0_32 = arith.constant 0 : index
    %57 = vector.load %arg0[%c3, %c0_31, %c0_32] : memref<4x25x432xf32, #tpu.memory_space<vmem>>, vector<1x25x432xf32>
    %58 = vector.shape_cast %57 : vector<1x25x432xf32> to vector<25x432xf32>
    %59 = arith.cmpf one, %58, %58 : vector<25x432xf32>
    %cst_33 = arith.constant 0.000000e+00 : f32
    %60 = vector.broadcast %cst_33 : f32 to vector<25x432xf32>
    %61 = arith.select %59, %60, %58 : vector<25x432xi1>, vector<25x432xf32>
    %cst_34 = arith.constant 0xFF800000 : f32
    %62 = vector.broadcast %cst_34 : f32 to vector<25x432xf32>
    %63 = arith.cmpf oeq, %61, %62 : vector<25x432xf32>
    %cst_35 = arith.constant -3.000000e+00 : f32
    %64 = vector.broadcast %cst_35 : f32 to vector<25x432xf32>
    %65 = arith.select %63, %64, %61 : vector<25x432xi1>, vector<25x432xf32>
    %cst_36 = arith.constant 0.000000e+00 : f32
    %66 = vector.broadcast %cst_36 : f32 to vector<25x432xf32>
    %67 = arith.subf %66, %65 : vector<25x432xf32>
    %cst_37 = arith.constant 0.333333343 : f32
    %68 = vector.broadcast %cst_37 : f32 to vector<25x432xf32>
    %69 = arith.mulf %67, %68 : vector<25x432xf32>
    %cst_38 = arith.constant 0.000000e+00 : f32
    %cst_39 = arith.constant 1.000000e+00 : f32
    %70 = vector.broadcast %cst_38 : f32 to vector<25x432xf32>
    %71 = arith.maximumf %70, %69 : vector<25x432xf32>
    %72 = vector.broadcast %cst_39 : f32 to vector<25x432xf32>
    %73 = arith.minimumf %72, %71 : vector<25x432xf32>
    %cst_40 = arith.constant dense<0.000000e+00> : vector<2x432xf32>
    %74 = tpu.matmul %0, %73, %cst_40 {dimension_numbers = #tpu.dot_dimension_numbers<[1], [0], [0], [1], [0, 0, 1, 1], [], []>} : vector<2x25xf32>, vector<25x432xf32>, vector<2x432xf32> -> vector<2x432xf32>
    %75 = arith.maximumf %56, %74 : vector<2x432xf32>
    %c0_41 = arith.constant 0 : index
    %c0_42 = arith.constant 0 : index
    %76 = vector.load %arg2[%c0_41, %c0_42] : memref<2x1xf32, #tpu.memory_space<vmem>>, vector<2x1xf32>
    %77 = vector.broadcast %76 : vector<2x1xf32> to vector<2x432xf32>
    %78 = arith.addf %75, %77 : vector<2x432xf32>
    %cst_43 = arith.constant 0.000000e+00 : f32
    %79 = vector.broadcast %cst_43 : f32 to vector<2x432xf32>
    %80 = arith.cmpf oge, %78, %79 : vector<2x432xf32>
    %cst_44 = arith.constant 0.00999999977 : f32
    %81 = vector.broadcast %cst_44 : f32 to vector<2x432xf32>
    %82 = arith.mulf %81, %78 : vector<2x432xf32>
    %83 = arith.select %80, %78, %82 : vector<2x432xi1>, vector<2x432xf32>
    %c0_45 = arith.constant 0 : index
    %c0_46 = arith.constant 0 : index
    %84 = vector.load %arg3[%c0_45, %c0_46] : memref<2x432xf32, #tpu.memory_space<vmem>>, vector<2x432xf32>
    tpu.vector_store %arg3[%c0_45, %c0_46], %83 {strides = array<i32>} : memref<2x432xf32, #tpu.memory_space<vmem>>, vector<2x432xf32>,
    return
  }
}

module attributes {stable_mosaic.version = 11 : i64} {
  func.func @_conv2_kernel(%arg0: memref<32x108xf32, #tpu.memory_space<vmem>>, %arg1: memref<4x32xf32, #tpu.memory_space<vmem>>, %arg2: memref<4x1xf32, #tpu.memory_space<vmem>>, %arg3: memref<4x108xf32, #tpu.memory_space<vmem>>) attributes {dimension_semantics = [], scalar_prefetch = 0 : i64, scratch_operands = 0 : i64, tpu.core_type = #tpu.core_type<tc>} {
    %c0 = arith.constant 0 : index
    %c0_0 = arith.constant 0 : index
    %0 = vector.load %arg1[%c0, %c0_0] : memref<4x32xf32, #tpu.memory_space<vmem>>, vector<4x32xf32>
    %c0_1 = arith.constant 0 : index
    %c0_2 = arith.constant 0 : index
    %1 = vector.load %arg0[%c0_1, %c0_2] : memref<32x108xf32, #tpu.memory_space<vmem>>, vector<32x108xf32>
    %cst = arith.constant dense<0.000000e+00> : vector<4x108xf32>
    %2 = tpu.matmul %0, %1, %cst {dimension_numbers = #tpu.dot_dimension_numbers<[1], [0], [0], [1], [0, 0, 1, 1], [], []>} : vector<4x32xf32>, vector<32x108xf32>, vector<4x108xf32> -> vector<4x108xf32>
    %c0_3 = arith.constant 0 : index
    %c0_4 = arith.constant 0 : index
    %3 = vector.load %arg2[%c0_3, %c0_4] : memref<4x1xf32, #tpu.memory_space<vmem>>, vector<4x1xf32>
    %4 = vector.broadcast %3 : vector<4x1xf32> to vector<4x108xf32>
    %5 = arith.addf %2, %4 : vector<4x108xf32>
    %cst_5 = arith.constant 0.000000e+00 : f32
    %6 = vector.broadcast %cst_5 : f32 to vector<4x108xf32>
    %7 = arith.cmpf oge, %5, %6 : vector<4x108xf32>
    %cst_6 = arith.constant 0.00999999977 : f32
    %8 = vector.broadcast %cst_6 : f32 to vector<4x108xf32>
    %9 = arith.mulf %8, %5 : vector<4x108xf32>
    %10 = arith.select %7, %5, %9 : vector<4x108xi1>, vector<4x108xf32>
    %c0_7 = arith.constant 0 : index
    %c0_8 = arith.constant 0 : index
    %11 = vector.load %arg3[%c0_7, %c0_8] : memref<4x108xf32, #tpu.memory_space<vmem>>, vector<4x108xf32>
    tpu.vector_store %arg3[%c0_7, %c0_8], %10 {strides = array<i32>} : memref<4x108xf32, #tpu.memory_space<vmem>>, vector<4x108xf32>,
    return
  }
}

module attributes {stable_mosaic.version = 11 : i64} {
  func.func @_gru_head_kernel(%arg0: i32, %arg1: memref<1x8x36xf32, #tpu.memory_space<vmem>>, %arg2: memref<1x8x16xf32, #tpu.memory_space<vmem>>, %arg3: memref<36x8xf32, #tpu.memory_space<vmem>>, %arg4: memref<1x8xf32, #tpu.memory_space<vmem>>, %arg5: memref<16x96xf32, #tpu.memory_space<vmem>>, %arg6: memref<8x96xf32, #tpu.memory_space<vmem>>, %arg7: memref<32x96xf32, #tpu.memory_space<vmem>>, %arg8: memref<1x96xf32, #tpu.memory_space<vmem>>, %arg9: memref<1x96xf32, #tpu.memory_space<vmem>>, %arg10: memref<32x32xf32, #tpu.memory_space<vmem>>, %arg11: memref<1x32xf32, #tpu.memory_space<vmem>>, %arg12: memref<32x32xf32, #tpu.memory_space<vmem>>, %arg13: memref<1x32xf32, #tpu.memory_space<vmem>>, %arg14: memref<32x32xf32, #tpu.memory_space<vmem>>, %arg15: memref<1x32xf32, #tpu.memory_space<vmem>>, %arg16: memref<32x20xf32, #tpu.memory_space<vmem>>, %arg17: memref<1x20xf32, #tpu.memory_space<vmem>>, %arg18: memref<1x8x20xf32, #tpu.memory_space<vmem>>, %arg19: memref<8x32xf32, #tpu.memory_space<vmem>>) attributes {dimension_semantics = [#tpu.dimension_semantics<arbitrary>], iteration_bounds = array<i64: 4>, scalar_prefetch = 0 : i64, scratch_operands = 1 : i64, tpu.core_type = #tpu.core_type<tc>, window_params = [{transform_indices = @transform_0, window_bounds = array<i64: 1, 8, 36>}, {transform_indices = @transform_1, window_bounds = array<i64: 1, 8, 16>}, {pipeline_mode = #tpu.pipeline_mode<synchronous>, transform_indices = @transform_2, window_bounds = array<i64: 36, 8>}, {pipeline_mode = #tpu.pipeline_mode<synchronous>, transform_indices = @transform_3, window_bounds = array<i64: 1, 8>}, {pipeline_mode = #tpu.pipeline_mode<synchronous>, transform_indices = @transform_4, window_bounds = array<i64: 16, 96>}, {pipeline_mode = #tpu.pipeline_mode<synchronous>, transform_indices = @transform_5, window_bounds = array<i64: 8, 96>}, {pipeline_mode = #tpu.pipeline_mode<synchronous>, transform_indices = @transform_6, window_bounds = array<i64: 32, 96>}, {pipeline_mode = #tpu.pipeline_mode<synchronous>, transform_indices = @transform_7, window_bounds = array<i64: 1, 96>}, {pipeline_mode = #tpu.pipeline_mode<synchronous>, transform_indices = @transform_8, window_bounds = array<i64: 1, 96>}, {pipeline_mode = #tpu.pipeline_mode<synchronous>, transform_indices = @transform_9, window_bounds = array<i64: 32, 32>}, {pipeline_mode = #tpu.pipeline_mode<synchronous>, transform_indices = @transform_10, window_bounds = array<i64: 1, 32>}, {pipeline_mode = #tpu.pipeline_mode<synchronous>, transform_indices = @transform_11, window_bounds = array<i64: 32, 32>}, {pipeline_mode = #tpu.pipeline_mode<synchronous>, transform_indices = @transform_12, window_bounds = array<i64: 1, 32>}, {pipeline_mode = #tpu.pipeline_mode<synchronous>, transform_indices = @transform_13, window_bounds = array<i64: 32, 32>}, {pipeline_mode = #tpu.pipeline_mode<synchronous>, transform_indices = @transform_14, window_bounds = array<i64: 1, 32>}, {pipeline_mode = #tpu.pipeline_mode<synchronous>, transform_indices = @transform_15, window_bounds = array<i64: 32, 20>}, {pipeline_mode = #tpu.pipeline_mode<synchronous>, transform_indices = @transform_16, window_bounds = array<i64: 1, 20>}, {transform_indices = @transform_17, window_bounds = array<i64: 1, 8, 20>}]} {
    %c0_i32 = arith.constant 0 : i32
    %0 = arith.cmpi eq, %arg0, %c0_i32 : i32
    %1 = arith.extui %0 : i1 to i32
    %c0_i32_0 = arith.constant 0 : i32
    %2 = arith.cmpi ne, %1, %c0_i32_0 : i32
    scf.if %2 {
      %cst_64 = arith.constant 0.000000e+00 : f32
      %105 = vector.broadcast %cst_64 : f32 to vector<8x32xf32>
      %c0_65 = arith.constant 0 : index
      %c0_66 = arith.constant 0 : index
      %106 = vector.load %arg19[%c0_65, %c0_66] : memref<8x32xf32, #tpu.memory_space<vmem>>, vector<8x32xf32>
      tpu.vector_store %arg19[%c0_65, %c0_66], %105 {strides = array<i32>} : memref<8x32xf32, #tpu.memory_space<vmem>>, vector<8x32xf32>,
    } else {
    }
    %c0 = arith.constant 0 : index
    %c0_1 = arith.constant 0 : index
    %c0_2 = arith.constant 0 : index
    %3 = vector.load %arg1[%c0, %c0_1, %c0_2] : memref<1x8x36xf32, #tpu.memory_space<vmem>>, vector<1x8x36xf32>
    %4 = vector.shape_cast %3 : vector<1x8x36xf32> to vector<8x36xf32>
    %c0_3 = arith.constant 0 : index
    %c0_4 = arith.constant 0 : index
    %c0_5 = arith.constant 0 : index
    %5 = vector.load %arg2[%c0_3, %c0_4, %c0_5] : memref<1x8x16xf32, #tpu.memory_space<vmem>>, vector<1x8x16xf32>
    %6 = vector.shape_cast %5 : vector<1x8x16xf32> to vector<8x16xf32>
    %c0_6 = arith.constant 0 : index
    %c0_7 = arith.constant 0 : index
    %7 = vector.load %arg19[%c0_6, %c0_7] : memref<8x32xf32, #tpu.memory_space<vmem>>, vector<8x32xf32>
    %c0_8 = arith.constant 0 : index
    %c0_9 = arith.constant 0 : index
    %8 = vector.load %arg3[%c0_8, %c0_9] : memref<36x8xf32, #tpu.memory_space<vmem>>, vector<36x8xf32>
    %cst = arith.constant dense<0.000000e+00> : vector<8x8xf32>
    %9 = tpu.matmul %4, %8, %cst {dimension_numbers = #tpu.dot_dimension_numbers<[1], [0], [0], [1], [0, 0, 1, 1], [], []>} : vector<8x36xf32>, vector<36x8xf32>, vector<8x8xf32> -> vector<8x8xf32>
    %c0_10 = arith.constant 0 : index
    %c0_11 = arith.constant 0 : index
    %10 = vector.load %arg4[%c0_10, %c0_11] : memref<1x8xf32, #tpu.memory_space<vmem>>, vector<1x8xf32>
    %11 = vector.broadcast %10 : vector<1x8xf32> to vector<8x8xf32>
    %12 = arith.addf %9, %11 : vector<8x8xf32>
    %cst_12 = arith.constant 0.000000e+00 : f32
    %13 = vector.broadcast %cst_12 : f32 to vector<8x8xf32>
    %14 = arith.cmpf oge, %12, %13 : vector<8x8xf32>
    %cst_13 = arith.constant 0.00999999977 : f32
    %15 = vector.broadcast %cst_13 : f32 to vector<8x8xf32>
    %16 = arith.mulf %15, %12 : vector<8x8xf32>
    %17 = arith.select %14, %12, %16 : vector<8x8xi1>, vector<8x8xf32>
    %c0_14 = arith.constant 0 : index
    %c0_15 = arith.constant 0 : index
    %18 = vector.load %arg5[%c0_14, %c0_15] : memref<16x96xf32, #tpu.memory_space<vmem>>, vector<16x96xf32>
    %cst_16 = arith.constant dense<0.000000e+00> : vector<8x96xf32>
    %19 = tpu.matmul %6, %18, %cst_16 {dimension_numbers = #tpu.dot_dimension_numbers<[1], [0], [0], [1], [0, 0, 1, 1], [], []>} : vector<8x16xf32>, vector<16x96xf32>, vector<8x96xf32> -> vector<8x96xf32>
    %c0_17 = arith.constant 0 : index
    %c0_18 = arith.constant 0 : index
    %20 = vector.load %arg6[%c0_17, %c0_18] : memref<8x96xf32, #tpu.memory_space<vmem>>, vector<8x96xf32>
    %cst_19 = arith.constant dense<0.000000e+00> : vector<8x96xf32>
    %21 = tpu.matmul %17, %20, %cst_19 {dimension_numbers = #tpu.dot_dimension_numbers<[1], [0], [0], [1], [0, 0, 1, 1], [], []>} : vector<8x8xf32>, vector<8x96xf32>, vector<8x96xf32> -> vector<8x96xf32>
    %22 = arith.addf %19, %21 : vector<8x96xf32>
    %c0_20 = arith.constant 0 : index
    %c0_21 = arith.constant 0 : index
    %23 = vector.load %arg8[%c0_20, %c0_21] : memref<1x96xf32, #tpu.memory_space<vmem>>, vector<1x96xf32>
    %24 = vector.broadcast %23 : vector<1x96xf32> to vector<8x96xf32>
    %25 = arith.addf %22, %24 : vector<8x96xf32>
    %c0_22 = arith.constant 0 : index
    %c0_23 = arith.constant 0 : index
    %26 = vector.load %arg7[%c0_22, %c0_23] : memref<32x96xf32, #tpu.memory_space<vmem>>, vector<32x96xf32>
    %cst_24 = arith.constant dense<0.000000e+00> : vector<8x96xf32>
    %27 = tpu.matmul %7, %26, %cst_24 {dimension_numbers = #tpu.dot_dimension_numbers<[1], [0], [0], [1], [0, 0, 1, 1], [], []>} : vector<8x32xf32>, vector<32x96xf32>, vector<8x96xf32> -> vector<8x96xf32>
    %c0_25 = arith.constant 0 : index
    %c0_26 = arith.constant 0 : index
    %28 = vector.load %arg9[%c0_25, %c0_26] : memref<1x96xf32, #tpu.memory_space<vmem>>, vector<1x96xf32>
    %29 = vector.broadcast %28 : vector<1x96xf32> to vector<8x96xf32>
    %30 = arith.addf %27, %29 : vector<8x96xf32>
    %31 = vector.extract_strided_slice %25 {offsets = [0, 0], sizes = [8, 32], strides = [1, 1]} : vector<8x96xf32> to vector<8x32xf32>
    %32 = vector.extract_strided_slice %30 {offsets = [0, 0], sizes = [8, 32], strides = [1, 1]} : vector<8x96xf32> to vector<8x32xf32>
    %33 = arith.addf %31, %32 : vector<8x32xf32>
    %34 = arith.negf %33 : vector<8x32xf32>
    %35 = math.exp %34 : vector<8x32xf32>
    %cst_27 = arith.constant 1.000000e+00 : f32
    %36 = vector.broadcast %cst_27 : f32 to vector<8x32xf32>
    %37 = arith.addf %36, %35 : vector<8x32xf32>
    %38 = arith.divf %36, %37 : vector<8x32xf32>
    %39 = vector.extract_strided_slice %25 {offsets = [0, 32], sizes = [8, 32], strides = [1, 1]} : vector<8x96xf32> to vector<8x32xf32>
    %40 = vector.extract_strided_slice %30 {offsets = [0, 32], sizes = [8, 32], strides = [1, 1]} : vector<8x96xf32> to vector<8x32xf32>
    %41 = arith.addf %39, %40 : vector<8x32xf32>
    %42 = arith.negf %41 : vector<8x32xf32>
    %43 = math.exp %42 : vector<8x32xf32>
    %cst_28 = arith.constant 1.000000e+00 : f32
    %44 = vector.broadcast %cst_28 : f32 to vector<8x32xf32>
    %45 = arith.addf %44, %43 : vector<8x32xf32>
    %46 = arith.divf %44, %45 : vector<8x32xf32>
    %47 = vector.extract_strided_slice %25 {offsets = [0, 64], sizes = [8, 32], strides = [1, 1]} : vector<8x96xf32> to vector<8x32xf32>
    %48 = vector.extract_strided_slice %30 {offsets = [0, 64], sizes = [8, 32], strides = [1, 1]} : vector<8x96xf32> to vector<8x32xf32>
    %49 = arith.mulf %38, %48 : vector<8x32xf32>
    %50 = arith.addf %47, %49 : vector<8x32xf32>
    %51 = math.tanh %50 : vector<8x32xf32>
    %cst_29 = arith.constant 1.000000e+00 : f32
    %52 = vector.broadcast %cst_29 : f32 to vector<8x32xf32>
    %53 = arith.subf %52, %46 : vector<8x32xf32>
    %54 = arith.mulf %53, %51 : vector<8x32xf32>
    %55 = arith.mulf %46, %7 : vector<8x32xf32>
    %56 = arith.addf %54, %55 : vector<8x32xf32>
    %c0_30 = arith.constant 0 : index
    %c0_31 = arith.constant 0 : index
    %57 = vector.load %arg19[%c0_30, %c0_31] : memref<8x32xf32, #tpu.memory_space<vmem>>, vector<8x32xf32>
    tpu.vector_store %arg19[%c0_30, %c0_31], %56 {strides = array<i32>} : memref<8x32xf32, #tpu.memory_space<vmem>>, vector<8x32xf32>,
    %c0_32 = arith.constant 0 : index
    %c0_33 = arith.constant 0 : index
    %58 = vector.load %arg10[%c0_32, %c0_33] : memref<32x32xf32, #tpu.memory_space<vmem>>, vector<32x32xf32>
    %cst_34 = arith.constant dense<0.000000e+00> : vector<8x32xf32>
    %59 = tpu.matmul %56, %58, %cst_34 {dimension_numbers = #tpu.dot_dimension_numbers<[1], [0], [0], [1], [0, 0, 1, 1], [], []>} : vector<8x32xf32>, vector<32x32xf32>, vector<8x32xf32> -> vector<8x32xf32>
    %c0_35 = arith.constant 0 : index
    %c0_36 = arith.constant 0 : index
    %60 = vector.load %arg11[%c0_35, %c0_36] : memref<1x32xf32, #tpu.memory_space<vmem>>, vector<1x32xf32>
    %61 = vector.broadcast %60 : vector<1x32xf32> to vector<8x32xf32>
    %62 = arith.addf %59, %61 : vector<8x32xf32>
    %cst_37 = arith.constant 0.000000e+00 : f32
    %63 = vector.broadcast %cst_37 : f32 to vector<8x32xf32>
    %64 = arith.cmpf ogt, %62, %63 : vector<8x32xf32>
    %cst_38 = arith.constant 0.000000e+00 : f32
    %65 = vector.broadcast %cst_38 : f32 to vector<8x32xf32>
    %66 = arith.minimumf %62, %65 : vector<8x32xf32>
    %67 = math.exp %66 : vector<8x32xf32>
    %cst_39 = arith.constant 1.000000e+00 : f32
    %68 = vector.broadcast %cst_39 : f32 to vector<8x32xf32>
    %69 = arith.subf %67, %68 : vector<8x32xf32>
    %70 = arith.select %64, %62, %69 : vector<8x32xi1>, vector<8x32xf32>
    %c0_40 = arith.constant 0 : index
    %c0_41 = arith.constant 0 : index
    %71 = vector.load %arg12[%c0_40, %c0_41] : memref<32x32xf32, #tpu.memory_space<vmem>>, vector<32x32xf32>
    %cst_42 = arith.constant dense<0.000000e+00> : vector<8x32xf32>
    %72 = tpu.matmul %70, %71, %cst_42 {dimension_numbers = #tpu.dot_dimension_numbers<[1], [0], [0], [1], [0, 0, 1, 1], [], []>} : vector<8x32xf32>, vector<32x32xf32>, vector<8x32xf32> -> vector<8x32xf32>
    %c0_43 = arith.constant 0 : index
    %c0_44 = arith.constant 0 : index
    %73 = vector.load %arg13[%c0_43, %c0_44] : memref<1x32xf32, #tpu.memory_space<vmem>>, vector<1x32xf32>
    %74 = vector.broadcast %73 : vector<1x32xf32> to vector<8x32xf32>
    %75 = arith.addf %72, %74 : vector<8x32xf32>
    %cst_45 = arith.constant 0.000000e+00 : f32
    %76 = vector.broadcast %cst_45 : f32 to vector<8x32xf32>
    %77 = arith.cmpf ogt, %75, %76 : vector<8x32xf32>
    %cst_46 = arith.constant 0.000000e+00 : f32
    %78 = vector.broadcast %cst_46 : f32 to vector<8x32xf32>
    %79 = arith.minimumf %75, %78 : vector<8x32xf32>
    %80 = math.exp %79 : vector<8x32xf32>
    %cst_47 = arith.constant 1.000000e+00 : f32
    %81 = vector.broadcast %cst_47 : f32 to vector<8x32xf32>
    %82 = arith.subf %80, %81 : vector<8x32xf32>
    %83 = arith.select %77, %75, %82 : vector<8x32xi1>, vector<8x32xf32>
    %c0_48 = arith.constant 0 : index
    %c0_49 = arith.constant 0 : index
    %84 = vector.load %arg14[%c0_48, %c0_49] : memref<32x32xf32, #tpu.memory_space<vmem>>, vector<32x32xf32>
    %cst_50 = arith.constant dense<0.000000e+00> : vector<8x32xf32>
    %85 = tpu.matmul %83, %84, %cst_50 {dimension_numbers = #tpu.dot_dimension_numbers<[1], [0], [0], [1], [0, 0, 1, 1], [], []>} : vector<8x32xf32>, vector<32x32xf32>, vector<8x32xf32> -> vector<8x32xf32>
    %c0_51 = arith.constant 0 : index
    %c0_52 = arith.constant 0 : index
    %86 = vector.load %arg15[%c0_51, %c0_52] : memref<1x32xf32, #tpu.memory_space<vmem>>, vector<1x32xf32>
    %87 = vector.broadcast %86 : vector<1x32xf32> to vector<8x32xf32>
    %88 = arith.addf %85, %87 : vector<8x32xf32>
    %cst_53 = arith.constant 0.000000e+00 : f32
    %89 = vector.broadcast %cst_53 : f32 to vector<8x32xf32>
    %90 = arith.cmpf ogt, %88, %89 : vector<8x32xf32>
    %cst_54 = arith.constant 0.000000e+00 : f32
    %91 = vector.broadcast %cst_54 : f32 to vector<8x32xf32>
    %92 = arith.minimumf %88, %91 : vector<8x32xf32>
    %93 = math.exp %92 : vector<8x32xf32>
    %cst_55 = arith.constant 1.000000e+00 : f32
    %94 = vector.broadcast %cst_55 : f32 to vector<8x32xf32>
    %95 = arith.subf %93, %94 : vector<8x32xf32>
    %96 = arith.select %90, %88, %95 : vector<8x32xi1>, vector<8x32xf32>
    %c0_56 = arith.constant 0 : index
    %c0_57 = arith.constant 0 : index
    %97 = vector.load %arg16[%c0_56, %c0_57] : memref<32x20xf32, #tpu.memory_space<vmem>>, vector<32x20xf32>
    %cst_58 = arith.constant dense<0.000000e+00> : vector<8x20xf32>
    %98 = tpu.matmul %96, %97, %cst_58 {dimension_numbers = #tpu.dot_dimension_numbers<[1], [0], [0], [1], [0, 0, 1, 1], [], []>} : vector<8x32xf32>, vector<32x20xf32>, vector<8x20xf32> -> vector<8x20xf32>
    %c0_59 = arith.constant 0 : index
    %c0_60 = arith.constant 0 : index
    %99 = vector.load %arg17[%c0_59, %c0_60] : memref<1x20xf32, #tpu.memory_space<vmem>>, vector<1x20xf32>
    %100 = vector.broadcast %99 : vector<1x20xf32> to vector<8x20xf32>
    %101 = arith.addf %98, %100 : vector<8x20xf32>
    %c0_61 = arith.constant 0 : index
    %c0_62 = arith.constant 0 : index
    %c0_63 = arith.constant 0 : index
    %102 = vector.load %arg18[%c0_61, %c0_62, %c0_63] : memref<1x8x20xf32, #tpu.memory_space<vmem>>, vector<1x8x20xf32>
    %103 = vector.shape_cast %102 : vector<1x8x20xf32> to vector<8x20xf32>
    %104 = vector.shape_cast %101 : vector<8x20xf32> to vector<1x8x20xf32>
    tpu.vector_store %arg18[%c0_61, %c0_62, %c0_63], %104 {strides = array<i32>} : memref<1x8x20xf32, #tpu.memory_space<vmem>>, vector<1x8x20xf32>,
    return
  }
  func.func @transform_0(%arg0: i32) -> (i32, i32, i32) {
    %c0_i32 = arith.constant 0 : i32
    %c0_i32_0 = arith.constant 0 : i32
    %c0_i32_1 = arith.constant 0 : i32
    return %arg0, %c0_i32, %c0_i32_0 : i32, i32, i32
  }
  func.func @transform_1(%arg0: i32) -> (i32, i32, i32) {
    %c0_i32 = arith.constant 0 : i32
    %c0_i32_0 = arith.constant 0 : i32
    %c0_i32_1 = arith.constant 0 : i32
    return %arg0, %c0_i32, %c0_i32_0 : i32, i32, i32
  }
  func.func @transform_2(%arg0: i32) -> (i32, i32) {
    %c0_i32 = arith.constant 0 : i32
    %c0_i32_0 = arith.constant 0 : i32
    %c0_i32_1 = arith.constant 0 : i32
    return %c0_i32, %c0_i32_0 : i32, i32
  }
  func.func @transform_3(%arg0: i32) -> (i32, i32) {
    %c0_i32 = arith.constant 0 : i32
    %c0_i32_0 = arith.constant 0 : i32
    %c0_i32_1 = arith.constant 0 : i32
    return %c0_i32, %c0_i32_0 : i32, i32
  }
  func.func @transform_4(%arg0: i32) -> (i32, i32) {
    %c0_i32 = arith.constant 0 : i32
    %c0_i32_0 = arith.constant 0 : i32
    %c0_i32_1 = arith.constant 0 : i32
    return %c0_i32, %c0_i32_0 : i32, i32
  }
  func.func @transform_5(%arg0: i32) -> (i32, i32) {
    %c0_i32 = arith.constant 0 : i32
    %c0_i32_0 = arith.constant 0 : i32
    %c0_i32_1 = arith.constant 0 : i32
    return %c0_i32, %c0_i32_0 : i32, i32
  }
  func.func @transform_6(%arg0: i32) -> (i32, i32) {
    %c0_i32 = arith.constant 0 : i32
    %c0_i32_0 = arith.constant 0 : i32
    %c0_i32_1 = arith.constant 0 : i32
    return %c0_i32, %c0_i32_0 : i32, i32
  }
  func.func @transform_7(%arg0: i32) -> (i32, i32) {
    %c0_i32 = arith.constant 0 : i32
    %c0_i32_0 = arith.constant 0 : i32
    %c0_i32_1 = arith.constant 0 : i32
    return %c0_i32, %c0_i32_0 : i32, i32
  }
  func.func @transform_8(%arg0: i32) -> (i32, i32) {
    %c0_i32 = arith.constant 0 : i32
    %c0_i32_0 = arith.constant 0 : i32
    %c0_i32_1 = arith.constant 0 : i32
    return %c0_i32, %c0_i32_0 : i32, i32
  }
  func.func @transform_9(%arg0: i32) -> (i32, i32) {
    %c0_i32 = arith.constant 0 : i32
    %c0_i32_0 = arith.constant 0 : i32
    %c0_i32_1 = arith.constant 0 : i32
    return %c0_i32, %c0_i32_0 : i32, i32
  }
  func.func @transform_10(%arg0: i32) -> (i32, i32) {
    %c0_i32 = arith.constant 0 : i32
    %c0_i32_0 = arith.constant 0 : i32
    %c0_i32_1 = arith.constant 0 : i32
    return %c0_i32, %c0_i32_0 : i32, i32
  }
  func.func @transform_11(%arg0: i32) -> (i32, i32) {
    %c0_i32 = arith.constant 0 : i32
    %c0_i32_0 = arith.constant 0 : i32
    %c0_i32_1 = arith.constant 0 : i32
    return %c0_i32, %c0_i32_0 : i32, i32
  }
  func.func @transform_12(%arg0: i32) -> (i32, i32) {
    %c0_i32 = arith.constant 0 : i32
    %c0_i32_0 = arith.constant 0 : i32
    %c0_i32_1 = arith.constant 0 : i32
    return %c0_i32, %c0_i32_0 : i32, i32
  }
  func.func @transform_13(%arg0: i32) -> (i32, i32) {
    %c0_i32 = arith.constant 0 : i32
    %c0_i32_0 = arith.constant 0 : i32
    %c0_i32_1 = arith.constant 0 : i32
    return %c0_i32, %c0_i32_0 : i32, i32
  }
  func.func @transform_14(%arg0: i32) -> (i32, i32) {
    %c0_i32 = arith.constant 0 : i32
    %c0_i32_0 = arith.constant 0 : i32
    %c0_i32_1 = arith.constant 0 : i32
    return %c0_i32, %c0_i32_0 : i32, i32
  }
  func.func @transform_15(%arg0: i32) -> (i32, i32) {
    %c0_i32 = arith.constant 0 : i32
    %c0_i32_0 = arith.constant 0 : i32
    %c0_i32_1 = arith.constant 0 : i32
    return %c0_i32, %c0_i32_0 : i32, i32
  }
  func.func @transform_16(%arg0: i32) -> (i32, i32) {
    %c0_i32 = arith.constant 0 : i32
    %c0_i32_0 = arith.constant 0 : i32
    %c0_i32_1 = arith.constant 0 : i32
    return %c0_i32, %c0_i32_0 : i32, i32
  }
  func.func @transform_17(%arg0: i32) -> (i32, i32, i32) {
    %c0_i32 = arith.constant 0 : i32
    %c0_i32_0 = arith.constant 0 : i32
    %c0_i32_1 = arith.constant 0 : i32
    return %arg0, %c0_i32, %c0_i32_0 : i32, i32, i32
  }
}

</mosaic_0001>

<bundles_post_ra>
// kernel: pallas_forward.3
= control target key start
LH: loop header
LB: loop body
LE: loop exit
PB: predicated region body
PF: predicated region fallthrough
CT: control target
= control target key end

     0   :  { %v1359_v3 = vmov 0.0   ;;  %vm163_vm3 = vcmask 1040384   ;;  %s1626_s0 = inlined_call_operand.vmem [shape: f32[4,25,432], index: 0, kind: input, shape index: {}]   ;;  %s1627_s1 = inlined_call_operand.vmem [shape: f32[2,25], index: 1, kind: input, shape index: {}]   ;;  %s1628_s2 = inlined_call_operand.vmem [shape: f32[2,1], index: 2, kind: input, shape index: {}]   ;;  %s1629_s3 = inlined_call_operand.vmem [shape: f32[2,432], index: 3, kind: output, shape index: {}]  }
   0x1   :  { %v28_v0 = vld [vmem:[%s1626_s0 + $0x68] sm:$0x1]  ;;  %v30_v1 = vld [vmem:[%s1626_s0 + $0x78] sm:$0x1]  ;;  %v27_v2 = vld [vmem:[%s1626_s0 + $0x60] sm:$0x1]  ;;  %240 = vmatprep.mubr.f32.mxu0 %v1359_v3  ;;  %311 = vmatprep.mubr.f32.mxu1 %v1359_v3 }
   0x2   :  { %vm44_vm0 = vcmp.ne.f32.partialorder %v28_v0, %v28_v0  ;;  %vm46_vm1 = vcmp.ne.f32.partialorder %v30_v1, %v30_v1  ;;  %vm43_vm2 = vcmp.ne.f32.partialorder %v27_v2, %v27_v2  ;;  %v29_v4 = vld [vmem:[%s1626_s0 + $0x70] sm:$0x1]  ;;  %v24_v8 = vld [vmem:[%s1626_s0 + $0x48] sm:$0xff]  ;;  %v26_v10 = vld [vmem:[%s1626_s0 + $0x58] sm:$0xff] }
   0x3   :  { %v60_v5 = vsel %vm44_vm0, 0.0, %v28_v0  ;;  %v62_v6 = vsel %vm46_vm1, 0.0, %v30_v1  ;;  %v59_v7 = vsel %vm43_vm2, 0.0, %v27_v2  ;;  %vm45_vm4 = vcmp.ne.f32.partialorder %v29_v4, %v29_v4  ;;  %v23_v11 = vld [vmem:[%s1626_s0 + $0x40] sm:$0xff]  ;;  %v25_v15 = vld [vmem:[%s1626_s0 + $0x50] sm:$0xff]  ;;  %v20_v33 = vld [vmem:[%s1626_s0 + $0x28] sm:$0xff] }
   0x4   :  { %vm76_vm5 = vcmp.eq.f32.partialorder %v60_v5, -inf  ;;  %vm78_vm6 = vcmp.eq.f32.partialorder %v62_v6, -inf  ;;  %vm75_vm7 = vcmp.eq.f32.partialorder %v59_v7, -inf  ;;  %v61_v9 = vsel %vm45_vm4, 0.0, %v29_v4  ;;  %v22_v38 = vld [vmem:[%s1626_s0 + $0x38] sm:$0xff]  ;;  %v19_v39 = vld [vmem:[%s1626_s0 + $0x20] sm:$0xff] }
   0x5   :  { %v92_v12 = vsel %vm76_vm5, -3.0, %v60_v5  ;;  %v94_v13 = vsel %vm78_vm6, -3.0, %v62_v6  ;;  %v91_v14 = vsel %vm75_vm7, -3.0, %v59_v7  ;;  %vm77_vm8 = vcmp.eq.f32.partialorder %v61_v9, -inf  ;;  %v21_v47 = vld [vmem:[%s1626_s0 + $0x30] sm:$0xff]  ;;  %v16_v1 = vld [vmem:[%s1626_s0 + $0x8] sm:$0xff] }
   0x6   :  { %v108_v16 = vsub.f32 0.0, %v92_v12  ;;  %v110_v17 = vsub.f32 0.0, %v94_v13  ;;  %v107_v18 = vsub.f32 0.0, %v91_v14  ;;  %v93_v19 = vsel %vm77_vm8, -3.0, %v61_v9  ;;  %v18_v2 = vld [vmem:[%s1626_s0 + $0x18] sm:$0xff]  ;;  %v15_v13 = vld [vmem:[%s1626_s0] sm:$0xff] }
   0x7   :  { %v109_v20 = vsub.f32 0.0, %v93_v19  ;;  %vm40_vm9 = vcmp.ne.f32.partialorder %v24_v8, %v24_v8  ;;  %vm42_vm10 = vcmp.ne.f32.partialorder %v26_v10, %v26_v10  ;;  %vm39_vm11 = vcmp.ne.f32.partialorder %v23_v11, %v23_v11 }
   0x8   :  { %v124_v21 = vmul.f32 0.33333334, %v108_v16  ;;  %v126_v22 = vmul.f32 0.33333334, %v110_v17  ;;  %v123_v23 = vmul.f32 0.33333334, %v107_v18  ;;  %vm41_vm12 = vcmp.ne.f32.partialorder %v25_v15, %v25_v15 }
   0x9   :  { %v125_v24 = vmul.f32 0.33333334, %v109_v20  ;;  %v56_v25 = vsel %vm40_vm9, 0.0, %v24_v8  ;;  %v58_v26 = vsel %vm42_vm10, 0.0, %v26_v10  ;;  %v55_v27 = vsel %vm39_vm11, 0.0, %v23_v11  ;;  %v17_v20 = vld [vmem:[%s1626_s0 + $0x10] sm:$0xff] }
   0xa   :  { %v140_v28 = vmax.f32 %v124_v21, 0.0  ;;  %v142_v29 = vmax.f32 %v126_v22, 0.0  ;;  %v139_v30 = vmax.f32 %v123_v23, 0.0  ;;  %vm72_vm13 = vcmp.eq.f32.partialorder %v56_v25, -inf }
   0xb   :  { %v141_v31 = vmax.f32 %v125_v24, 0.0  ;;  %v88_v32 = vsel %vm72_vm13, -3.0, %v56_v25  ;;  %vm74_vm14 = vcmp.eq.f32.partialorder %v58_v26, -inf  ;;  %vm71_vm15 = vcmp.eq.f32.partialorder %v55_v27, -inf  ;;  %v1302_v25 = vld [vmem:[%s1626_s0 + $0xe8] sm:$0x1] }
   0xc   :  { %v156_v34 = vmin.f32 %v140_v28, 1.0  ;;  %v158_v35 = vmin.f32 %v142_v29, 1.0  ;;  %v155_v36 = vmin.f32 %v139_v30, 1.0  ;;  %v104_v37 = vsub.f32 0.0, %v88_v32  ;;  %v1304_v30 = vld [vmem:[%s1626_s0 + $0xf8] sm:$0x1] }
   0xd   :  { %v157_v40 = vmin.f32 %v141_v31, 1.0  ;;  %v90_v41 = vsel %vm74_vm14, -3.0, %v58_v26  ;;  %v87_v42 = vsel %vm71_vm15, -3.0, %v55_v27  ;;  %v57_v43 = vsel %vm41_vm12, 0.0, %v25_v15 }
   0xe   :  { %1283 = vmatprep.subr.msk.mxu0 %vm163_vm3, %v156_v34  ;;  %1286 = vmatprep.subr.msk.mxu1 %vm163_vm3, %v158_v35  ;;  %v120_v44 = vmul.f32 0.33333334, %v104_v37  ;;  %v106_v45 = vsub.f32 0.0, %v90_v41  ;;  %v103_v46 = vsub.f32 0.0, %v87_v42  ;;  %vm73_vm0 = vcmp.eq.f32.partialorder %v57_v43, -inf }
   0xf   :  { %1284 = vmatpush1.msk.msra.mxu0 %vm163_vm3, %v155_v36  ;;  %1287 = vmatpush1.msk.msra.mxu1 %vm163_vm3, %v157_v40  ;;  %v89_v48 = vsel %vm73_vm0, -3.0, %v57_v43  ;;  %vm36_vm1 = vcmp.ne.f32.partialorder %v20_v33, %v20_v33  ;;  %vm38_vm2 = vcmp.ne.f32.partialorder %v22_v38, %v22_v38  ;;  %vm35_vm4 = vcmp.ne.f32.partialorder %v19_v39, %v19_v39  ;;  %v1301_v41 = vld [vmem:[%s1626_s0 + $0xe0] sm:$0x1] }
  0x10   :  { %v136_v49 = vmax.f32 %v120_v44, 0.0  ;;  %v122_v50 = vmul.f32 0.33333334, %v106_v45  ;;  %v119_v51 = vmul.f32 0.33333334, %v103_v46  ;;  %v105_v52 = vsub.f32 0.0, %v89_v48 }
  0x11   :  { %v52_v53 = vsel %vm36_vm1, 0.0, %v20_v33  ;;  %v54_v54 = vsel %vm38_vm2, 0.0, %v22_v38  ;;  %v51_v55 = vsel %vm35_vm4, 0.0, %v19_v39  ;;  %vm37_vm5 = vcmp.ne.f32.partialorder %v21_v47, %v21_v47 }
  0x12   :  { %v152_v56 = vmin.f32 %v136_v49, 1.0  ;;  %v138_v57 = vmax.f32 %v122_v50, 0.0  ;;  %v135_v58 = vmax.f32 %v119_v51, 0.0  ;;  %v121_v59 = vmul.f32 0.33333334, %v105_v52 }
  0x13   :  { %vm68_vm6 = vcmp.eq.f32.partialorder %v52_v53, -inf  ;;  %vm70_vm7 = vcmp.eq.f32.partialorder %v54_v54, -inf  ;;  %vm67_vm8 = vcmp.eq.f32.partialorder %v51_v55, -inf  ;;  %v53_v60 = vsel %vm37_vm5, 0.0, %v21_v47  ;;  %v1303_v49 = vld [vmem:[%s1626_s0 + $0xf0] sm:$0x1] }
  0x14   :  { %202 = vmatprep.subr.mxu0 %v152_v56  ;;  %v154_v61 = vmin.f32 %v138_v57, 1.0  ;;  %v151_v62 = vmin.f32 %v135_v58, 1.0  ;;  %v137_v63 = vmax.f32 %v121_v59, 0.0  ;;  %v84_v0 = vsel %vm68_vm6, -3.0, %v52_v53  ;;  %v1452_v57 = vld [vmem:[%s1627_s1] sm:$0x3] }
  0x15   :  { %v100_v4 = vsub.f32 0.0, %v84_v0  ;;  %v86_v5 = vsel %vm70_vm7, -3.0, %v54_v54  ;;  %v83_v6 = vsel %vm67_vm8, -3.0, %v51_v55  ;;  %vm69_vm9 = vcmp.eq.f32.partialorder %v53_v60, -inf  ;;  %v1298_v59 = vld [vmem:[%s1626_s0 + $0xc8] sm:$0xff]  ;;  %v1300_v0 = vld [vmem:[%s1626_s0 + $0xd8] sm:$0xff] }
  0x16   :  { %273 = vmatprep.subr.mxu1 %v154_v61  ;;  %203 = vmatpush1.msra.mxu0 %v151_v62  ;;  %v153_v7 = vmin.f32 %v137_v63, 1.0  ;;  %v102_v8 = vsub.f32 0.0, %v86_v5  ;;  %v99_v9 = vsub.f32 0.0, %v83_v6  ;;  %v85_v10 = vsel %vm69_vm9, -3.0, %v53_v60  ;;  %v1297_v5 = vld [vmem:[%s1626_s0 + $0xc0] sm:$0xff] }
  0x17   :  { %v116_v11 = vmul.f32 0.33333334, %v100_v4  ;;  %v101_v12 = vsub.f32 0.0, %v85_v10  ;;  %vm32_vm10 = vcmp.ne.f32.partialorder %v16_v1, %v16_v1  ;;  %vm34_vm11 = vcmp.ne.f32.partialorder %v18_v2, %v18_v2 }
  0x18   :  { %274 = vmatpush1.msra.mxu1 %v153_v7  ;;  %v118_v14 = vmul.f32 0.33333334, %v102_v8  ;;  %v115_v15 = vmul.f32 0.33333334, %v99_v9  ;;  %v48_v16 = vsel %vm32_vm10, 0.0, %v16_v1  ;;  %v50_v17 = vsel %vm34_vm11, 0.0, %v18_v2 }
  0x19   :  { %v132_v18 = vmax.f32 %v116_v11, 0.0  ;;  %v117_v19 = vmul.f32 0.33333334, %v101_v12  ;;  %vm64_vm12 = vcmp.eq.f32.partialorder %v48_v16, -inf  ;;  %vm66_vm13 = vcmp.eq.f32.partialorder %v50_v17, -inf }
  0x1a   :  { %v134_v21 = vmax.f32 %v118_v14, 0.0  ;;  %v131_v22 = vmax.f32 %v115_v15, 0.0  ;;  %v80_v23 = vsel %vm64_vm12, -3.0, %v48_v16  ;;  %v82_v24 = vsel %vm66_vm13, -3.0, %v50_v17 }
  0x1b   :  { %v148_v26 = vmin.f32 %v132_v18, 1.0  ;;  %v133_v27 = vmax.f32 %v117_v19, 0.0  ;;  %v96_v28 = vsub.f32 0.0, %v80_v23  ;;  %v98_v29 = vsub.f32 0.0, %v82_v24  ;;  %v1294_v24 = vld [vmem:[%s1626_s0 + $0xa8] sm:$0xff] }
  0x1c   :  { %v150_v31 = vmin.f32 %v134_v21, 1.0  ;;  %v147_v32 = vmin.f32 %v131_v22, 1.0  ;;  %vm31_vm14 = vcmp.ne.f32.partialorder %v15_v13, %v15_v13  ;;  %vm33_vm15 = vcmp.ne.f32.partialorder %v17_v20, %v17_v20 }
  0x1d   :  { %204 = vmatprep.subr.mxu0 %v148_v26  ;;  %v149_v33 = vmin.f32 %v133_v27, 1.0  ;;  %v112_v34 = vmul.f32 0.33333334, %v96_v28  ;;  %v114_v35 = vmul.f32 0.33333334, %v98_v29  ;;  %v47_v36 = vsel %vm31_vm14, 0.0, %v15_v13 }
  0x1e   :  { %275 = vmatprep.subr.mxu1 %v150_v31  ;;  %205 = vmatpush1.msra.mxu0 %v147_v32  ;;  %vm63_vm0 = vcmp.eq.f32.partialorder %v47_v36, -inf  ;;  %v49_v37 = vsel %vm33_vm15, 0.0, %v17_v20  ;;  %vm159_vm1 = vcmask 203776   ;;  %vm348_vm2 = vcmp.ne.f32.partialorder %v1302_v25, %v1302_v25  ;;  %v1299_v13 = vld [vmem:[%s1626_s0 + $0xd0] sm:$0xff] }
  0x1f   :  { %vm350_vm4 = vcmp.ne.f32.partialorder %v1304_v30, %v1304_v30  ;;  %276 = vmatpush1.msra.mxu1 %v149_v33  ;;  %v128_v38 = vmax.f32 %v112_v34, 0.0  ;;  %v130_v39 = vmax.f32 %v114_v35, 0.0  ;;  %v79_v40 = vsel %vm63_vm0, -3.0, %v47_v36  ;;  %v1293_v33 = vld [vmem:[%s1626_s0 + $0xa0] sm:$0xff]  ;;  %v1295_v36 = vld [vmem:[%s1626_s0 + $0xb0] sm:$0xff] }
  0x20   :  { %vm65_vm5 = vcmp.eq.f32.partialorder %v49_v37, -inf  ;;  %v95_v42 = vsub.f32 0.0, %v79_v40  ;;  %v364_v44 = vsel %vm348_vm2, 0.0, %v1302_v25  ;;  %v366_v45 = vsel %vm350_vm4, 0.0, %v1304_v30  ;;  %v1296_v25 = vld [vmem:[%s1626_s0 + $0xb8] sm:$0xff] }
  0x21   :  { %v81_v43 = vsel %vm65_vm5, -3.0, %v49_v37  ;;  %v144_v46 = vmin.f32 %v128_v38, 1.0  ;;  %v146_v47 = vmin.f32 %v130_v39, 1.0  ;;  %vm380_vm6 = vcmp.eq.f32.partialorder %v364_v44, -inf }
  0x22   :  { %v97_v48 = vsub.f32 0.0, %v81_v43  ;;  %v111_v50 = vmul.f32 0.33333334, %v95_v42  ;;  %v396_v51 = vsel %vm380_vm6, -3.0, %v364_v44  ;;  %vm382_vm7 = vcmp.eq.f32.partialorder %v366_v45, -inf }
  0x23   :  { %vm347_vm8 = vcmp.ne.f32.partialorder %v1301_v41, %v1301_v41  ;;  %206 = vmatprep.subr.mxu0 %v144_v46  ;;  %277 = vmatprep.subr.mxu1 %v146_v47  ;;  %v412_v53 = vsub.f32 0.0, %v396_v51  ;;  %v398_v54 = vsel %vm382_vm7, -3.0, %v366_v45  ;;  %vm349_vm10 = vcmp.ne.f32.partialorder %v1303_v49, %v1303_v49 }
  0x24   :  { %v113_v52 = vmul.f32 0.33333334, %v97_v48  ;;  %v363_v55 = vsel %vm347_vm8, 0.0, %v1301_v41  ;;  %v127_v56 = vmax.f32 %v111_v50, 0.0  ;;  %v414_v58 = vsub.f32 0.0, %v398_v54  ;;  %v1292_v54 = vld [vmem:[%s1626_s0 + $0x98] sm:$0xff] }
  0x25   :  { %vm379_vm9 = vcmp.eq.f32.partialorder %v363_v55, -inf  ;;  %v428_v61 = vmul.f32 0.33333334, %v412_v53  ;;  %v365_v63 = vsel %vm349_vm10, 0.0, %v1303_v49  ;;  %vm344_vm12 = vcmp.ne.f32.partialorder %v1298_v59, %v1298_v59  ;;  %v1290_v49 = vld [vmem:[%s1626_s0 + $0x88] sm:$0xff] }
  0x26   :  { %v129_v60 = vmax.f32 %v113_v52, 0.0  ;;  %v395_v62 = vsel %vm379_vm9, -3.0, %v363_v55  ;;  %v143_v1 = vmin.f32 %v127_v56, 1.0  ;;  %v430_v2 = vmul.f32 0.33333334, %v414_v58 }
  0x27   :  { %v411_v4 = vsub.f32 0.0, %v395_v62  ;;  %vm381_vm11 = vcmp.eq.f32.partialorder %v365_v63, -inf  ;;  %v444_v7 = vmax.f32 %v428_v61, 0.0  ;;  %v360_v12 = vsel %vm344_vm12, 0.0, %v1298_v59  ;;  %v1289_v59 = vld [vmem:[%s1626_s0 + $0x80] sm:$0xff] }
  0x28   :  { %v145_v6 = vmin.f32 %v129_v60, 1.0  ;;  %v397_v8 = vsel %vm381_vm11, -3.0, %v365_v63  ;;  %207 = vmatpush1.msra.mxu0 %v143_v1  ;;  %v446_v9 = vmax.f32 %v430_v2, 0.0  ;;  %vm376_vm13 = vcmp.eq.f32.partialorder %v360_v12, -inf }
  0x29   :  { %v427_v10 = vmul.f32 0.33333334, %v411_v4  ;;  %v413_v11 = vsub.f32 0.0, %v397_v8  ;;  %1285 = vmatmul.mubr.msk.f32.vlgmr.msra.gmra.mxu0 %vm159_vm1, %v1452_v57  ;;  %v460_v14 = vmin.f32 %v444_v7, 1.0  ;;  %vm346_vm14 = vcmp.ne.f32.partialorder %v1300_v0, %v1300_v0  ;;  %v1291_v8 = vld [vmem:[%s1626_s0 + $0x90] sm:$0xff] }
  0x2a   :  { %278 = vmatpush1.msra.mxu1 %v145_v6  ;;  %vm343_vm15 = vcmp.ne.f32.partialorder %v1297_v5, %v1297_v5  ;;  %v462_v15 = vmin.f32 %v446_v9, 1.0  ;;  %v392_v18 = vsel %vm376_vm13, -3.0, %v360_v12  ;;  %539 = vmatprep.mubr.f32.mxu0 %v1359_v3  ;;  %v362_v20 = vsel %vm346_vm14, 0.0, %v1300_v0 }
  0x2b   :  { %1288 = vmatmul.mubr.msk.f32.vlgmr.msra.gmra.mxu1 %vm159_vm1, %v1452_v57  ;;  %v443_v16 = vmax.f32 %v427_v10, 0.0  ;;  %v429_v17 = vmul.f32 0.33333334, %v413_v11  ;;  %1305 = vmatprep.subr.msk.mxu0 %vm163_vm3, %v460_v14  ;;  %v408_v19 = vsub.f32 0.0, %v392_v18  ;;  %v359_v21 = vsel %vm343_vm15, 0.0, %v1297_v5 }
  0x2c   :  { %vm345_vm0 = vcmp.ne.f32.partialorder %v1299_v13, %v1299_v13  ;;  %610 = vmatprep.mubr.f32.mxu1 %v1359_v3  ;;  %1308 = vmatprep.subr.msk.mxu1 %vm163_vm3, %v462_v15  ;;  %vm378_vm2 = vcmp.eq.f32.partialorder %v362_v20, -inf  ;;  %vm375_vm4 = vcmp.eq.f32.partialorder %v359_v21, -inf  ;;  %vm340_vm6 = vcmp.ne.f32.partialorder %v1294_v24, %v1294_v24 }
  0x2d   :  { %v459_v22 = vmin.f32 %v443_v16, 1.0  ;;  %v445_v23 = vmax.f32 %v429_v17, 0.0  ;;  %v424_v26 = vmul.f32 0.33333334, %v408_v19  ;;  %v394_v27 = vsel %vm378_vm2, -3.0, %v362_v20 }
  0x2e   :  { %v391_v28 = vsel %vm375_vm4, -3.0, %v359_v21  ;;  %v361_v29 = vsel %vm345_vm0, 0.0, %v1299_v13  ;;  %v410_v31 = vsub.f32 0.0, %v394_v27  ;;  %vm342_vm7 = vcmp.ne.f32.partialorder %v1296_v25, %v1296_v25  ;;  %v1324_v16 = vld [vmem:[%s1626_s0 + $0x168] sm:$0x1] }
  0x2f   :  { %1306 = vmatpush1.msk.msra.mxu0 %vm163_vm3, %v459_v22  ;;  %v461_v30 = vmin.f32 %v445_v23, 1.0  ;;  %v407_v32 = vsub.f32 0.0, %v391_v28  ;;  %vm377_vm5 = vcmp.eq.f32.partialorder %v361_v29, -inf  ;;  %v440_v34 = vmax.f32 %v424_v26, 0.0  ;;  %v1326_v19 = vld [vmem:[%s1626_s0 + $0x178] sm:$0x1] }
  0x30   :  { %v393_v35 = vsel %vm377_vm5, -3.0, %v361_v29  ;;  %v426_v37 = vmul.f32 0.33333334, %v410_v31  ;;  %v356_v40 = vsel %vm340_vm6, 0.0, %v1294_v24  ;;  %v358_v42 = vsel %vm342_vm7, 0.0, %v1296_v25 }
  0x31   :  { %1309 = vmatpush1.msk.msra.mxu1 %vm163_vm3, %v461_v30  ;;  %v423_v38 = vmul.f32 0.33333334, %v407_v32  ;;  %v409_v39 = vsub.f32 0.0, %v393_v35  ;;  %v456_v41 = vmin.f32 %v440_v34, 1.0  ;;  %vm372_vm8 = vcmp.eq.f32.partialorder %v356_v40, -inf }
  0x32   :  { %vm339_vm9 = vcmp.ne.f32.partialorder %v1293_v33, %v1293_v33  ;;  %v442_v43 = vmax.f32 %v426_v37, 0.0  ;;  %v388_v46 = vsel %vm372_vm8, -3.0, %v356_v40  ;;  %vm374_vm10 = vcmp.eq.f32.partialorder %v358_v42, -inf  ;;  %v1323_v27 = vld [vmem:[%s1626_s0 + $0x160] sm:$0x1] }
  0x33   :  { %v439_v44 = vmax.f32 %v423_v38, 0.0  ;;  %v425_v45 = vmul.f32 0.33333334, %v409_v39  ;;  %501 = vmatprep.subr.mxu0 %v456_v41  ;;  %v404_v47 = vsub.f32 0.0, %v388_v46  ;;  %v355_v48 = vsel %vm339_vm9, 0.0, %v1293_v33 }
  0x34   :  { %vm341_vm11 = vcmp.ne.f32.partialorder %v1295_v36, %v1295_v36  ;;  %v458_v50 = vmin.f32 %v442_v43, 1.0  ;;  %v390_v53 = vsel %vm374_vm10, -3.0, %v358_v42  ;;  %vm371_vm12 = vcmp.eq.f32.partialorder %v355_v48, -inf  ;;  %v1325_v40 = vld [vmem:[%s1626_s0 + $0x170] sm:$0x1] }
  0x35   :  { %v455_v51 = vmin.f32 %v439_v44, 1.0  ;;  %v441_v52 = vmax.f32 %v425_v45, 0.0  ;;  %v420_v55 = vmul.f32 0.33333334, %v404_v47  ;;  %v406_v56 = vsub.f32 0.0, %v390_v53  ;;  %v1320_v44 = vld [vmem:[%s1626_s0 + $0x148] sm:$0xff] }
  0x36   :  { %v357_v58 = vsel %vm341_vm11, 0.0, %v1295_v36  ;;  %572 = vmatprep.subr.mxu1 %v458_v50  ;;  %v387_v61 = vsel %vm371_vm12, -3.0, %v355_v48  ;;  %vm336_vm14 = vcmp.ne.f32.partialorder %v1290_v49, %v1290_v49  ;;  %vm338_vm15 = vcmp.ne.f32.partialorder %v1292_v54, %v1292_v54 }
  0x37   :  { %502 = vmatpush1.msra.mxu0 %v455_v51  ;;  %v457_v60 = vmin.f32 %v441_v52, 1.0  ;;  %vm373_vm13 = vcmp.eq.f32.partialorder %v357_v58, -inf  ;;  %v436_v62 = vmax.f32 %v420_v55, 0.0  ;;  %v422_v63 = vmul.f32 0.33333334, %v406_v56 }
  0x38   :  { %v403_v0 = vsub.f32 0.0, %v387_v61  ;;  %v389_v1 = vsel %vm373_vm13, -3.0, %v357_v58  ;;  %v352_v4 = vsel %vm336_vm14, 0.0, %v1290_v49  ;;  %vm335_vm0 = vcmp.ne.f32.partialorder %v1289_v59, %v1289_v59 }
  0x39   :  { %573 = vmatpush1.msra.mxu1 %v457_v60  ;;  %v405_v2 = vsub.f32 0.0, %v389_v1  ;;  %v452_v5 = vmin.f32 %v436_v62, 1.0  ;;  %v438_v6 = vmax.f32 %v422_v63, 0.0  ;;  %vm368_vm2 = vcmp.eq.f32.partialorder %v352_v4, -inf }
  0x3a   :  { %v419_v7 = vmul.f32 0.33333334, %v403_v0  ;;  %v384_v10 = vsel %vm368_vm2, -3.0, %v352_v4  ;;  %v354_v11 = vsel %vm338_vm15, 0.0, %v1292_v54  ;;  %v351_v12 = vsel %vm335_vm0, 0.0, %v1289_v59  ;;  %v1322_v54 = vld [vmem:[%s1626_s0 + $0x158] sm:$0xff] }
  0x3b   :  { %v421_v9 = vmul.f32 0.33333334, %v405_v2  ;;  %503 = vmatprep.subr.mxu0 %v452_v5  ;;  %v454_v13 = vmin.f32 %v438_v6, 1.0  ;;  %v400_v15 = vsub.f32 0.0, %v384_v10  ;;  %vm370_vm4 = vcmp.eq.f32.partialorder %v354_v11, -inf  ;;  %v1319_v59 = vld [vmem:[%s1626_s0 + $0x140] sm:$0xff] }
  0x3c   :  { %v435_v14 = vmax.f32 %v419_v7, 0.0  ;;  %v386_v18 = vsel %vm370_vm4, -3.0, %v354_v11  ;;  %vm367_vm5 = vcmp.eq.f32.partialorder %v351_v12, -inf  ;;  %vm337_vm6 = vcmp.ne.f32.partialorder %v1291_v8, %v1291_v8  ;;  %v1321_v6 = vld [vmem:[%s1626_s0 + $0x150] sm:$0xff]  ;;  %v1316_v10 = vld [vmem:[%s1626_s0 + $0x128] sm:$0xff] }
  0x3d   :  { %v437_v17 = vmax.f32 %v421_v9, 0.0  ;;  %574 = vmatprep.subr.mxu1 %v454_v13  ;;  %v416_v21 = vmul.f32 0.33333334, %v400_v15  ;;  %v402_v22 = vsub.f32 0.0, %v386_v18  ;;  %v383_v23 = vsel %vm367_vm5, -3.0, %v351_v12 }
  0x3e   :  { %v451_v20 = vmin.f32 %v435_v14, 1.0  ;;  %v399_v25 = vsub.f32 0.0, %v383_v23  ;;  %v353_v26 = vsel %vm337_vm6, 0.0, %v1291_v8  ;;  %vm651_vm7 = vcmp.ne.f32.partialorder %v1324_v16, %v1324_v16 }
  0x3f   :  { %v453_v24 = vmin.f32 %v437_v17, 1.0  ;;  %v432_v28 = vmax.f32 %v416_v21, 0.0  ;;  %v418_v29 = vmul.f32 0.33333334, %v402_v22  ;;  %vm369_vm8 = vcmp.eq.f32.partialorder %v353_v26, -inf }
  0x40   :  { %504 = vmatpush1.msra.mxu0 %v451_v20  ;;  %v667_v30 = vsel %vm651_vm7, 0.0, %v1324_v16  ;;  %v415_v31 = vmul.f32 0.33333334, %v399_v25  ;;  %v385_v32 = vsel %vm369_vm8, -3.0, %v353_v26  ;;  %vm653_vm10 = vcmp.ne.f32.partialorder %v1326_v19, %v1326_v19  ;;  %v1318_v20 = vld [vmem:[%s1626_s0 + $0x138] sm:$0xff] }
  0x41   :  { %575 = vmatpush1.msra.mxu1 %v453_v24  ;;  %vm683_vm9 = vcmp.eq.f32.partialorder %v667_v30, -inf  ;;  %v448_v33 = vmin.f32 %v432_v28, 1.0  ;;  %v434_v34 = vmax.f32 %v418_v29, 0.0  ;;  %v401_v35 = vsub.f32 0.0, %v385_v32  ;;  %v1315_v24 = vld [vmem:[%s1626_s0 + $0x120] sm:$0xff] }
  0x42   :  { %v699_v36 = vsel %vm683_vm9, -3.0, %v667_v30  ;;  %v431_v37 = vmax.f32 %v415_v31, 0.0  ;;  %v669_v39 = vsel %vm653_vm10, 0.0, %v1326_v19  ;;  %vm650_vm11 = vcmp.ne.f32.partialorder %v1323_v27, %v1323_v27 }
  0x43   :  { %v715_v38 = vsub.f32 0.0, %v699_v36  ;;  %505 = vmatprep.subr.mxu0 %v448_v33  ;;  %v450_v41 = vmin.f32 %v434_v34, 1.0  ;;  %v417_v42 = vmul.f32 0.33333334, %v401_v35  ;;  %vm685_vm12 = vcmp.eq.f32.partialorder %v669_v39, -inf  ;;  %v1317_v34 = vld [vmem:[%s1626_s0 + $0x130] sm:$0xff] }
  0x44   :  { %v666_v43 = vsel %vm650_vm11, 0.0, %v1323_v27  ;;  %v447_v45 = vmin.f32 %v431_v37, 1.0  ;;  %v701_v47 = vsel %vm685_vm12, -3.0, %v669_v39  ;;  %vm652_vm14 = vcmp.ne.f32.partialorder %v1325_v40, %v1325_v40 }
  0x45   :  { %v731_v46 = vmul.f32 0.33333334, %v715_v38  ;;  %vm682_vm13 = vcmp.eq.f32.partialorder %v666_v43, -inf  ;;  %576 = vmatprep.subr.mxu1 %v450_v41  ;;  %v433_v48 = vmax.f32 %v417_v42, 0.0  ;;  %v717_v49 = vsub.f32 0.0, %v701_v47  ;;  %v1312_v38 = vld [vmem:[%s1626_s0 + $0x108] sm:$0xff] }
  0x46   :  { %v698_v50 = vsel %vm682_vm13, -3.0, %v666_v43  ;;  %506 = vmatpush1.msra.mxu0 %v447_v45  ;;  %v668_v53 = vsel %vm652_vm14, 0.0, %v1325_v40  ;;  %vm647_vm15 = vcmp.ne.f32.partialorder %v1320_v44, %v1320_v44  ;;  %vm649_vm4 = vcmp.ne.f32.partialorder %v1322_v54, %v1322_v54 }
  0x47   :  { %v747_v51 = vmax.f32 %v731_v46, 0.0  ;;  %v714_v52 = vsub.f32 0.0, %v698_v50  ;;  %v449_v55 = vmin.f32 %v433_v48, 1.0  ;;  %1307 = vmatmul.mubr.msk.f32.vlgmr.msra.gmra.mxu0 %vm159_vm1, %v1452_v57  ;;  %v733_v56 = vmul.f32 0.33333334, %v717_v49  ;;  %v1314_v48 = vld [vmem:[%s1626_s0 + $0x118] sm:$0xff] }
  0x48   :  { %vm684_vm0 = vcmp.eq.f32.partialorder %v668_v53, -inf  ;;  %v663_v58 = vsel %vm647_vm15, 0.0, %v1320_v44  ;;  %842 = vmatprep.mubr.f32.mxu0 %v1359_v3  ;;  %v665_v5 = vsel %vm649_vm4, 0.0, %v1322_v54  ;;  %vm646_vm5 = vcmp.ne.f32.partialorder %v1319_v59, %v1319_v59 }
  0x49   :  { %v763_v60 = vmin.f32 %v747_v51, 1.0  ;;  %v730_v61 = vmul.f32 0.33333334, %v714_v52  ;;  %v700_v62 = vsel %vm684_vm0, -3.0, %v668_v53  ;;  %vm679_vm2 = vcmp.eq.f32.partialorder %v663_v58, -inf  ;;  %577 = vmatpush1.msra.mxu1 %v449_v55  ;;  %v1311_v52 = vld [vmem:[%s1626_s0 + $0x100] sm:$0xff] }
  0x4a   :  { %v749_v63 = vmax.f32 %v733_v56, 0.0  ;;  %v716_v0 = vsub.f32 0.0, %v700_v62  ;;  %v695_v1 = vsel %vm679_vm2, -3.0, %v663_v58  ;;  %1310 = vmatmul.mubr.msk.f32.vlgmr.msra.gmra.mxu1 %vm159_vm1, %v1452_v57  ;;  %vm681_vm6 = vcmp.eq.f32.partialorder %v665_v5, -inf }
  0x4b   :  { %1327 = vmatprep.subr.msk.mxu0 %vm163_vm3, %v763_v60  ;;  %v746_v2 = vmax.f32 %v730_v61, 0.0  ;;  %v711_v4 = vsub.f32 0.0, %v695_v1  ;;  %v662_v9 = vsel %vm646_vm5, 0.0, %v1319_v59  ;;  %913 = vmatprep.mubr.f32.mxu1 %v1359_v3  ;;  %v697_v13 = vsel %vm681_vm6, -3.0, %v665_v5 }
  0x4c   :  { %v765_v7 = vmin.f32 %v749_v63, 1.0  ;;  %v732_v8 = vmul.f32 0.33333334, %v716_v0  ;;  %vm678_vm7 = vcmp.eq.f32.partialorder %v662_v9, -inf  ;;  %v713_v15 = vsub.f32 0.0, %v697_v13  ;;  %v1313_v63 = vld [vmem:[%s1626_s0 + $0x110] sm:$0xff] }
  0x4d   :  { %v762_v11 = vmin.f32 %v746_v2, 1.0  ;;  %v727_v12 = vmul.f32 0.33333334, %v711_v4  ;;  %v694_v16 = vsel %vm678_vm7, -3.0, %v662_v9  ;;  %vm648_vm8 = vcmp.ne.f32.partialorder %v1321_v6, %v1321_v6  ;;  %v1346_v0 = vld [vmem:[%s1626_s0 + $0x1e8] sm:$0x1] }
  0x4e   :  { %1330 = vmatprep.subr.msk.mxu1 %vm163_vm3, %v765_v7  ;;  %v748_v14 = vmax.f32 %v732_v8, 0.0  ;;  %v710_v18 = vsub.f32 0.0, %v694_v16  ;;  %v664_v19 = vsel %vm648_vm8, 0.0, %v1321_v6  ;;  %vm643_vm9 = vcmp.ne.f32.partialorder %v1316_v10, %v1316_v10 }
  0x4f   :  { %1328 = vmatpush1.msk.msra.mxu0 %vm163_vm3, %v762_v11  ;;  %v743_v17 = vmax.f32 %v727_v12, 0.0  ;;  %v729_v22 = vmul.f32 0.33333334, %v713_v15  ;;  %vm680_vm10 = vcmp.eq.f32.partialorder %v664_v19, -inf  ;;  %v659_v23 = vsel %vm643_vm9, 0.0, %v1316_v10 }
  0x50   :  { %v764_v21 = vmin.f32 %v748_v14, 1.0  ;;  %v726_v26 = vmul.f32 0.33333334, %v710_v18  ;;  %v696_v27 = vsel %vm680_vm10, -3.0, %v664_v19  ;;  %vm675_vm11 = vcmp.eq.f32.partialorder %v659_v23, -inf }
  0x51   :  { %v759_v25 = vmin.f32 %v743_v17, 1.0  ;;  %v745_v28 = vmax.f32 %v729_v22, 0.0  ;;  %v712_v29 = vsub.f32 0.0, %v696_v27  ;;  %v691_v30 = vsel %vm675_vm11, -3.0, %v659_v23  ;;  %v1348_v11 = vld [vmem:[%s1626_s0 + $0x1f8] sm:$0x1] }
  0x52   :  { %1331 = vmatpush1.msk.msra.mxu1 %vm163_vm3, %v764_v21  ;;  %vm645_vm12 = vcmp.ne.f32.partialorder %v1318_v20, %v1318_v20  ;;  %v742_v31 = vmax.f32 %v726_v26, 0.0  ;;  %v707_v32 = vsub.f32 0.0, %v691_v30  ;;  %vm642_vm13 = vcmp.ne.f32.partialorder %v1315_v24, %v1315_v24  ;;  %v1345_v15 = vld [vmem:[%s1626_s0 + $0x1e0] sm:$0x1] }
  0x53   :  { %804 = vmatprep.subr.mxu0 %v759_v25  ;;  %v661_v33 = vsel %vm645_vm12, 0.0, %v1318_v20  ;;  %v761_v35 = vmin.f32 %v745_v28, 1.0  ;;  %v728_v36 = vmul.f32 0.33333334, %v712_v29  ;;  %v658_v37 = vsel %vm642_vm13, 0.0, %v1315_v24 }
  0x54   :  { %vm677_vm14 = vcmp.eq.f32.partialorder %v661_v33, -inf  ;;  %v758_v39 = vmin.f32 %v742_v31, 1.0  ;;  %v723_v40 = vmul.f32 0.33333334, %v707_v32  ;;  %vm674_vm15 = vcmp.eq.f32.partialorder %v658_v37, -inf  ;;  %v1342_v32 = vld [vmem:[%s1626_s0 + $0x1c8] sm:$0xff] }
  0x55   :  { %v693_v41 = vsel %vm677_vm14, -3.0, %v661_v33  ;;  %875 = vmatprep.subr.mxu1 %v761_v35  ;;  %v744_v42 = vmax.f32 %v728_v36, 0.0  ;;  %v690_v44 = vsel %vm674_vm15, -3.0, %v658_v37  ;;  %vm644_vm0 = vcmp.ne.f32.partialorder %v1317_v34, %v1317_v34  ;;  %v1347_v28 = vld [vmem:[%s1626_s0 + $0x1f0] sm:$0x1] }
  0x56   :  { %v709_v43 = vsub.f32 0.0, %v693_v41  ;;  %805 = vmatpush1.msra.mxu0 %v758_v39  ;;  %v739_v45 = vmax.f32 %v723_v40, 0.0  ;;  %v706_v46 = vsub.f32 0.0, %v690_v44  ;;  %v660_v47 = vsel %vm644_vm0, 0.0, %v1317_v34 }
  0x57   :  { %vm639_vm2 = vcmp.ne.f32.partialorder %v1312_v38, %v1312_v38  ;;  %v760_v49 = vmin.f32 %v744_v42, 1.0  ;;  %vm676_vm4 = vcmp.eq.f32.partialorder %v660_v47, -inf  ;;  %vm641_vm6 = vcmp.ne.f32.partialorder %v1314_v48, %v1314_v48  ;;  %v1344_v42 = vld [vmem:[%s1626_s0 + $0x1d8] sm:$0xff] }
  0x58   :  { %v725_v50 = vmul.f32 0.33333334, %v709_v43  ;;  %v655_v51 = vsel %vm639_vm2, 0.0, %v1312_v38  ;;  %v755_v53 = vmin.f32 %v739_v45, 1.0  ;;  %v722_v54 = vmul.f32 0.33333334, %v706_v46 }
  0x59   :  { %v692_v55 = vsel %vm676_vm4, -3.0, %v660_v47  ;;  %vm671_vm5 = vcmp.eq.f32.partialorder %v655_v51, -inf  ;;  %876 = vmatpush1.msra.mxu1 %v760_v49  ;;  %v657_v62 = vsel %vm641_vm6, 0.0, %v1314_v48  ;;  %vm638_vm7 = vcmp.ne.f32.partialorder %v1311_v52, %v1311_v52  ;;  %v1341_v46 = vld [vmem:[%s1626_s0 + $0x1c0] sm:$0xff] }
  0x5a   :  { %v741_v56 = vmax.f32 %v725_v50, 0.0  ;;  %v708_v58 = vsub.f32 0.0, %v692_v55  ;;  %v687_v59 = vsel %vm671_vm5, -3.0, %v655_v51  ;;  %806 = vmatprep.subr.mxu0 %v755_v53  ;;  %v738_v60 = vmax.f32 %v722_v54, 0.0 }
  0x5b   :  { %v703_v61 = vsub.f32 0.0, %v687_v59  ;;  %vm673_vm8 = vcmp.eq.f32.partialorder %v657_v62, -inf  ;;  %v654_v4 = vsel %vm638_vm7, 0.0, %v1311_v52  ;;  %vm640_vm10 = vcmp.ne.f32.partialorder %v1313_v63, %v1313_v63 }
  0x5c   :  { %v757_v1 = vmin.f32 %v741_v56, 1.0  ;;  %v724_v2 = vmul.f32 0.33333334, %v708_v58  ;;  %v754_v5 = vmin.f32 %v738_v60, 1.0  ;;  %v689_v7 = vsel %vm673_vm8, -3.0, %v657_v62  ;;  %v1343_v56 = vld [vmem:[%s1626_s0 + $0x1d0] sm:$0xff] }
  0x5d   :  { %v719_v6 = vmul.f32 0.33333334, %v703_v61  ;;  %vm670_vm9 = vcmp.eq.f32.partialorder %v654_v4, -inf  ;;  %v705_v9 = vsub.f32 0.0, %v689_v7  ;;  %v656_v14 = vsel %vm640_vm10, 0.0, %v1313_v63  ;;  %v1338_v61 = vld [vmem:[%s1626_s0 + $0x1a8] sm:$0xff] }
  0x5e   :  { %877 = vmatprep.subr.mxu1 %v757_v1  ;;  %v740_v8 = vmax.f32 %v724_v2, 0.0  ;;  %v686_v10 = vsel %vm670_vm9, -3.0, %v654_v4  ;;  %807 = vmatpush1.msra.mxu0 %v754_v5  ;;  %vm954_vm11 = vcmp.ne.f32.partialorder %v1346_v0, %v1346_v0  ;;  %vm672_vm12 = vcmp.eq.f32.partialorder %v656_v14, -inf }
  0x5f   :  { %v735_v12 = vmax.f32 %v719_v6, 0.0  ;;  %v702_v13 = vsub.f32 0.0, %v686_v10  ;;  %v721_v17 = vmul.f32 0.33333334, %v705_v9  ;;  %v970_v18 = vsel %vm954_vm11, 0.0, %v1346_v0 }
  0x60   :  { %v756_v16 = vmin.f32 %v740_v8, 1.0  ;;  %v688_v21 = vsel %vm672_vm12, -3.0, %v656_v14  ;;  %vm986_vm13 = vcmp.eq.f32.partialorder %v970_v18, -inf  ;;  %vm956_vm14 = vcmp.ne.f32.partialorder %v1348_v11, %v1348_v11 }
  0x61   :  { %v751_v19 = vmin.f32 %v735_v12, 1.0  ;;  %v718_v20 = vmul.f32 0.33333334, %v702_v13  ;;  %v737_v22 = vmax.f32 %v721_v17, 0.0  ;;  %v704_v23 = vsub.f32 0.0, %v688_v21  ;;  %v1339_v21 = vld [vmem:[%s1626_s0 + $0x1b0] sm:$0xff] }
  0x62   :  { %878 = vmatpush1.msra.mxu1 %v756_v16  ;;  %v1002_v24 = vsel %vm986_vm13, -3.0, %v970_v18  ;;  %v972_v27 = vsel %vm956_vm14, 0.0, %v1348_v11  ;;  %vm953_vm15 = vcmp.ne.f32.partialorder %v1345_v15, %v1345_v15  ;;  %vm955_vm4 = vcmp.ne.f32.partialorder %v1347_v28, %v1347_v28  ;;  %v1337_v11 = vld [vmem:[%s1626_s0 + $0x1a0] sm:$0xff] }
  0x63   :  { %808 = vmatprep.subr.mxu0 %v751_v19  ;;  %v734_v25 = vmax.f32 %v718_v20, 0.0  ;;  %v1018_v26 = vsub.f32 0.0, %v1002_v24  ;;  %v753_v29 = vmin.f32 %v737_v22, 1.0  ;;  %v720_v30 = vmul.f32 0.33333334, %v704_v23 }
  0x64   :  { %vm988_vm0 = vcmp.eq.f32.partialorder %v972_v27, -inf  ;;  %v969_v31 = vsel %vm953_vm15, 0.0, %v1345_v15  ;;  %v971_v41 = vsel %vm955_vm4, 0.0, %v1347_v28  ;;  %vm950_vm5 = vcmp.ne.f32.partialorder %v1342_v32, %v1342_v32 }
  0x65   :  { %v750_v33 = vmin.f32 %v734_v25, 1.0  ;;  %v1034_v34 = vmul.f32 0.33333334, %v1018_v26  ;;  %v1004_v35 = vsel %vm988_vm0, -3.0, %v972_v27  ;;  %vm985_vm2 = vcmp.eq.f32.partialorder %v969_v31, -inf  ;;  %879 = vmatprep.subr.mxu1 %v753_v29  ;;  %v1334_v25 = vld [vmem:[%s1626_s0 + $0x188] sm:$0xff] }
  0x66   :  { %v736_v36 = vmax.f32 %v720_v30, 0.0  ;;  %v1020_v37 = vsub.f32 0.0, %v1004_v35  ;;  %v1001_v38 = vsel %vm985_vm2, -3.0, %v969_v31  ;;  %vm987_vm6 = vcmp.eq.f32.partialorder %v971_v41, -inf  ;;  %v1336_v35 = vld [vmem:[%s1626_s0 + $0x198] sm:$0xff] }
  0x67   :  { %809 = vmatpush1.msra.mxu0 %v750_v33  ;;  %v1050_v39 = vmax.f32 %v1034_v34, 0.0  ;;  %v1017_v40 = vsub.f32 0.0, %v1001_v38  ;;  %v966_v45 = vsel %vm950_vm5, 0.0, %v1342_v32  ;;  %v1003_v49 = vsel %vm987_vm6, -3.0, %v971_v41 }
  0x68   :  { %v752_v43 = vmin.f32 %v736_v36, 1.0  ;;  %1329 = vmatmul.mubr.msk.f32.vlgmr.msra.gmra.mxu0 %vm159_vm1, %v1452_v57  ;;  %v1036_v44 = vmul.f32 0.33333334, %v1020_v37  ;;  %vm982_vm7 = vcmp.eq.f32.partialorder %v966_v45, -inf  ;;  %v1019_v51 = vsub.f32 0.0, %v1003_v49  ;;  %v1335_v49 = vld [vmem:[%s1626_s0 + $0x190] sm:$0xff] }
  0x69   :  { %v1066_v47 = vmin.f32 %v1050_v39, 1.0  ;;  %v1033_v48 = vmul.f32 0.33333334, %v1017_v40  ;;  %1145 = vmatprep.mubr.f32.mxu0 %v1359_v3  ;;  %v998_v52 = vsel %vm982_vm7, -3.0, %v966_v45  ;;  %vm952_vm8 = vcmp.ne.f32.partialorder %v1344_v42, %v1344_v42  ;;  %v1333_v39 = vld [vmem:[%s1626_s0 + $0x180] sm:$0xff] }
  0x6a   :  { %880 = vmatpush1.msra.mxu1 %v752_v43  ;;  %v1052_v50 = vmax.f32 %v1036_v44, 0.0  ;;  %v1014_v54 = vsub.f32 0.0, %v998_v52  ;;  %v968_v55 = vsel %vm952_vm8, 0.0, %v1344_v42  ;;  %vm949_vm9 = vcmp.ne.f32.partialorder %v1341_v46, %v1341_v46 }
  0x6b   :  { %1332 = vmatmul.mubr.msk.f32.vlgmr.msra.gmra.mxu1 %vm159_vm1, %v1452_v57  ;;  %1349 = vmatprep.subr.msk.mxu0 %vm163_vm3, %v1066_v47  ;;  %v1049_v53 = vmax.f32 %v1033_v48, 0.0  ;;  %v1035_v59 = vmul.f32 0.33333334, %v1019_v51  ;;  %vm984_vm10 = vcmp.eq.f32.partialorder %v968_v55, -inf  ;;  %v965_v60 = vsel %vm949_vm9, 0.0, %v1341_v46 }
  0x6c   :  { %v1068_v58 = vmin.f32 %v1052_v50, 1.0  ;;  %1216 = vmatprep.mubr.f32.mxu1 %v1359_v3  ;;  %v1030_v63 = vmul.f32 0.33333334, %v1014_v54  ;;  %v1000_v0 = vsel %vm984_vm10, -3.0, %v968_v55  ;;  %vm981_vm11 = vcmp.eq.f32.partialorder %v965_v60, -inf  ;;  %v1340_v3 = vld [vmem:[%s1626_s0 + $0x1b8] sm:$0xff] }
  0x6d   :  { %v1065_v62 = vmin.f32 %v1049_v53, 1.0  ;;  %v1051_v1 = vmax.f32 %v1035_v59, 0.0  ;;  %v1016_v2 = vsub.f32 0.0, %v1000_v0  ;;  %v997_v4 = vsel %vm981_vm11, -3.0, %v965_v60  ;;  %v1227_v60 = vld [vmem:[%s1628_s2] sm:$0x3] }
  0x6e   :  { %1352 = vmatprep.subr.msk.mxu1 %vm163_vm3, %v1068_v58  ;;  %vm951_vm12 = vcmp.ne.f32.partialorder %v1343_v56, %v1343_v56  ;;  %v1046_v5 = vmax.f32 %v1030_v63, 0.0  ;;  %v1013_v6 = vsub.f32 0.0, %v997_v4  ;;  %vm946_vm13 = vcmp.ne.f32.partialorder %v1338_v61, %v1338_v61 }
  0x6f   :  { %1350 = vmatpush1.msk.msra.mxu0 %vm163_vm3, %v1065_v62  ;;  %v967_v7 = vsel %vm951_vm12, 0.0, %v1343_v56  ;;  %v1067_v8 = vmin.f32 %v1051_v1, 1.0  ;;  %v1032_v9 = vmul.f32 0.33333334, %v1016_v2  ;;  %v962_v10 = vsel %vm946_vm13, 0.0, %v1338_v61 }
  0x70   :  { %vm983_vm14 = vcmp.eq.f32.partialorder %v967_v7, -inf  ;;  %v1062_v12 = vmin.f32 %v1046_v5, 1.0  ;;  %v1029_v13 = vmul.f32 0.33333334, %v1013_v6  ;;  %vm978_vm15 = vcmp.eq.f32.partialorder %v962_v10, -inf }
  0x71   :  { %v999_v14 = vsel %vm983_vm14, -3.0, %v967_v7  ;;  %1353 = vmatpush1.msk.msra.mxu1 %vm163_vm3, %v1067_v8  ;;  %v1048_v15 = vmax.f32 %v1032_v9, 0.0  ;;  %v994_v17 = vsel %vm978_vm15, -3.0, %v962_v10  ;;  %vm948_vm0 = vcmp.ne.f32.partialorder %v1340_v3, %v1340_v3 }
  0x72   :  { %v1015_v16 = vsub.f32 0.0, %v999_v14  ;;  %1107 = vmatprep.subr.mxu0 %v1062_v12  ;;  %v1045_v18 = vmax.f32 %v1029_v13, 0.0  ;;  %v1010_v19 = vsub.f32 0.0, %v994_v17  ;;  %v964_v20 = vsel %vm948_vm0, 0.0, %v1340_v3 }
  0x73   :  { %vm945_vm2 = vcmp.ne.f32.partialorder %v1337_v11, %v1337_v11  ;;  %v1064_v22 = vmin.f32 %v1048_v15, 1.0  ;;  %vm980_vm4 = vcmp.eq.f32.partialorder %v964_v20, -inf  ;;  %vm947_vm5 = vcmp.ne.f32.partialorder %v1339_v21, %v1339_v21 }
  0x74   :  { %v1031_v23 = vmul.f32 0.33333334, %v1015_v16  ;;  %v961_v24 = vsel %vm945_vm2, 0.0, %v1337_v11  ;;  %v1061_v26 = vmin.f32 %v1045_v18, 1.0  ;;  %v1026_v27 = vmul.f32 0.33333334, %v1010_v19 }
  0x75   :  { %v996_v28 = vsel %vm980_vm4, -3.0, %v964_v20  ;;  %vm977_vm3 = vcmp.eq.f32.partialorder %v961_v24, -inf  ;;  %1178 = vmatprep.subr.mxu1 %v1064_v22  ;;  %v963_v34 = vsel %vm947_vm5, 0.0, %v1339_v21  ;;  %vm942_vm6 = vcmp.ne.f32.partialorder %v1334_v25, %v1334_v25 }
  0x76   :  { %v1047_v29 = vmax.f32 %v1031_v23, 0.0  ;;  %v1012_v30 = vsub.f32 0.0, %v996_v28  ;;  %v993_v31 = vsel %vm977_vm3, -3.0, %v961_v24  ;;  %1108 = vmatpush1.msra.mxu0 %v1061_v26  ;;  %v1042_v32 = vmax.f32 %v1026_v27, 0.0 }
  0x77   :  { %v1009_v33 = vsub.f32 0.0, %v993_v31  ;;  %vm979_vm7 = vcmp.eq.f32.partialorder %v963_v34, -inf  ;;  %v958_v38 = vsel %vm942_vm6, 0.0, %v1334_v25  ;;  %vm944_vm9 = vcmp.ne.f32.partialorder %v1336_v35, %v1336_v35 }
  0x78   :  { %v1063_v36 = vmin.f32 %v1047_v29, 1.0  ;;  %v1028_v37 = vmul.f32 0.33333334, %v1012_v30  ;;  %v1058_v40 = vmin.f32 %v1042_v32, 1.0  ;;  %v995_v42 = vsel %vm979_vm7, -3.0, %v963_v34 }
  0x79   :  { %v1025_v41 = vmul.f32 0.33333334, %v1009_v33  ;;  %vm974_vm8 = vcmp.eq.f32.partialorder %v958_v38, -inf  ;;  %v1011_v44 = vsub.f32 0.0, %v995_v42  ;;  %v960_v48 = vsel %vm944_vm9, 0.0, %v1336_v35 }
  0x7a   :  { %1179 = vmatpush1.msra.mxu1 %v1063_v36  ;;  %v1044_v43 = vmax.f32 %v1028_v37, 0.0  ;;  %v990_v45 = vsel %vm974_vm8, -3.0, %v958_v38  ;;  %1109 = vmatprep.subr.mxu0 %v1058_v40  ;;  %vm941_vm10 = vcmp.ne.f32.partialorder %v1333_v39, %v1333_v39  ;;  %vm976_vm11 = vcmp.eq.f32.partialorder %v960_v48, -inf }
  0x7b   :  { %v1041_v46 = vmax.f32 %v1025_v41, 0.0  ;;  %v1006_v47 = vsub.f32 0.0, %v990_v45  ;;  %v1027_v51 = vmul.f32 0.33333334, %v1011_v44  ;;  %v957_v52 = vsel %vm941_vm10, 0.0, %v1333_v39 }
  0x7c   :  { %v1060_v50 = vmin.f32 %v1044_v43, 1.0  ;;  %v992_v55 = vsel %vm976_vm11, -3.0, %v960_v48  ;;  %vm973_vm12 = vcmp.eq.f32.partialorder %v957_v52, -inf  ;;  %vm943_vm13 = vcmp.ne.f32.partialorder %v1335_v49, %v1335_v49 }
  0x7d   :  { %v1057_v53 = vmin.f32 %v1041_v46, 1.0  ;;  %v1022_v54 = vmul.f32 0.33333334, %v1006_v47  ;;  %v1043_v56 = vmax.f32 %v1027_v51, 0.0  ;;  %v1008_v58 = vsub.f32 0.0, %v992_v55 }
  0x7e   :  { %1180 = vmatprep.subr.mxu1 %v1060_v50  ;;  %v989_v59 = vsel %vm973_vm12, -3.0, %v957_v52  ;;  %v959_v63 = vsel %vm943_vm13, 0.0, %v1335_v49  ;;  %v1360_v2 = vmov 0   ;;  %v1361_v33 = vmov 1983009808  }
  0x7f   :  { %1110 = vmatpush1.msra.mxu0 %v1057_v53  ;;  %v1038_v61 = vmax.f32 %v1022_v54, 0.0  ;;  %v1005_v62 = vsub.f32 0.0, %v989_v59  ;;  %v1059_v0 = vmin.f32 %v1043_v56, 1.0  ;;  %v1024_v1 = vmul.f32 0.33333334, %v1008_v58  ;;  %1358 = vset.pattern.permute.xlu0 %v1360_v2 }
  0x80   :  { %vm975_vm14 = vcmp.eq.f32.partialorder %v959_v63, -inf  ;;  %1230 = vperm.xlu0 %1358, %v1227_v60   ;;  %v1256_v34 = vunpack.c.l.s4 %v1361_v33  ;;  %v1258_v35 = vlaneseq  ;;  %vm1271_vm0 = vcmask 1041408  }
  0x81   :  { %v1054_v4 = vmin.f32 %v1038_v61, 1.0  ;;  %v1021_v5 = vmul.f32 0.33333334, %v1005_v62  ;;  %v991_v6 = vsel %vm975_vm14, -3.0, %v959_v63  ;;  %1181 = vmatpush1.msra.mxu1 %v1059_v0  ;;  %v1040_v7 = vmax.f32 %v1024_v1, 0.0 }
  0x82   :  { %v1007_v3 = vsub.f32 0.0, %v991_v6  ;;  %v1257_v46 = vunpack.c.0.s8 %v1256_v34  ;;  %v1259_v47 = vshrl.u32 %v1258_v35, 7  ;;  %vm1272_vm2 = vcmask 1043458  }
  0x83   :  { %1111 = vmatprep.subr.mxu0 %v1054_v4  ;;  %v1037_v8 = vmax.f32 %v1021_v5, 0.0  ;;  %v1056_v9 = vmin.f32 %v1040_v7, 1.0  ;;  %vm1273_vm5 = vmor %vm1272_vm2, %vm1271_vm0  ;;  %vm1274_vm6 = vcmask 1045508   ;;  %vm1276_vm8 = vcmask 392198  }
  0x84   :  { %v1023_v10 = vmul.f32 0.33333334, %v1007_v3  ;;  %v1260_v56 = vsub.s32 %v1257_v46, %v1259_v47  ;;  %vm1275_vm7 = vmor %vm1274_vm6, %vm1273_vm5 }
  0x85   :  { %v1053_v11 = vmin.f32 %v1037_v8, 1.0  ;;  %1182 = vmatprep.subr.mxu1 %v1056_v9  ;;  %vm1277_vm9 = vmor %vm1276_vm8, %vm1275_vm7 }
  0x86   :  { %v1039_v12 = vmax.f32 %v1023_v10, 0.0 }
  0x87   :  { %1112 = vmatpush1.msra.mxu0 %v1053_v11 }
  0x88   :  { %v1055_v13 = vmin.f32 %v1039_v12, 1.0  ;;  %1351 = vmatmul.mubr.msk.f32.vlgmr.msra.gmra.mxu0 %vm159_vm1, %v1452_v57 }
  0x8a   :  { %1183 = vmatpush1.msra.mxu1 %v1055_v13 }
  0x8b   :  { %1354 = vmatmul.mubr.msk.f32.vlgmr.msra.gmra.mxu1 %vm159_vm1, %v1452_v57 }
  0xe9   :  { %v242_v14 = vpop.f32.mrf.mxu0 }
  0xeb   :  { %v313_v15 = vpop.f32.mrf.mxu1  ;;  %v244_v16 = vpop.f32.mrf.mxu0 }
  0xed   :  { %v315_v18 = vpop.f32.mrf.mxu1 }
  0xfb   :  { %v1231_v30 = vpop.permute.xlu0 %1230 }
 0x107   :  { %v541_v17 = vpop.f32.mrf.mxu0 }
 0x108   :  { %v617_v23 = vmax.f32 %v242_v14, %v541_v17 }
 0x109   :  { %v543_v20 = vpop.f32.mrf.mxu0 }
 0x10a   :  { %v612_v19 = vpop.f32.mrf.mxu1  ;;  %v618_v26 = vmax.f32 %v244_v16, %v543_v20 }
 0x10b   :  { %v619_v28 = vmax.f32 %v313_v15, %v612_v19 }
 0x10c   :  { %v614_v22 = vpop.f32.mrf.mxu1 }
 0x10d   :  { %v620_v36 = vmax.f32 %v315_v18, %v614_v22 }
 0x128   :  { %v844_v21 = vpop.f32.mrf.mxu0 }
 0x129   :  { %v920_v27 = vmax.f32 %v617_v23, %v844_v21 }
 0x12a   :  { %v846_v25 = vpop.f32.mrf.mxu0 }
 0x12b   :  { %v915_v24 = vpop.f32.mrf.mxu1  ;;  %v921_v31 = vmax.f32 %v618_v26, %v846_v25 }
 0x12c   :  { %v922_v37 = vmax.f32 %v619_v28, %v915_v24 }
 0x12d   :  { %v917_v32 = vpop.f32.mrf.mxu1 }
 0x12e   :  { %v923_v42 = vmax.f32 %v620_v36, %v917_v32 }
 0x148   :  { %v1147_v29 = vpop.f32.mrf.mxu0 }
 0x149   :  { %v1223_v57 = vmax.f32 %v920_v27, %v1147_v29 }
 0x14a   :  { %v1149_v38 = vpop.f32.mrf.mxu0 }
 0x14b   :  { %v1218_v39 = vpop.f32.mrf.mxu1  ;;  %v1233_v40 = vadd.f32 %v1231_v30, %v1223_v57  ;;  %v1224_v41 = vmax.f32 %v921_v31, %v1149_v38 }
 0x14c   :  { %v1225_v43 = vmax.f32 %v922_v37, %v1218_v39 }
 0x14d   :  { %v1241_v44 = vmul.f32 0.01, %v1233_v40  ;;  %v1234_v45 = vadd.f32 %v1231_v30, %v1224_v41  ;;  %v1220_v48 = vpop.f32.mrf.mxu1  ;;  %vm1237_vm1 = vcmp.ge.f32.partialorder %v1233_v40, 0.0 }
 0x14e   :  { %v1235_v49 = vadd.f32 %v1231_v30, %v1225_v43  ;;  %v1226_v50 = vmax.f32 %v923_v42, %v1220_v48 }
 0x14f   :  { %vm1238_vm15 = vcmp.ge.f32.partialorder %v1234_v45, 0.0  ;;  %v1242_v51 = vmul.f32 0.01, %v1234_v45  ;;  %v1245_v54 = vsel %vm1237_vm1, %v1233_v40, %v1241_v44 }
 0x150   :  { %v1243_v52 = vmul.f32 0.01, %v1235_v49  ;;  %v1236_v53 = vadd.f32 %v1231_v30, %v1226_v50  ;;  %vm1239_vm4 = vcmp.ge.f32.partialorder %v1235_v49, 0.0 }
 0x151   :  { %v1246_v55 = vsel %vm1238_vm15, %v1234_v45, %v1242_v51 }
 0x152   :  { %v1253_v58 = vcombine.low %v1245_v54, %v1246_v55  ;;  %vm1240_vm3 = vcmp.ge.f32.partialorder %v1236_v53, 0.0  ;;  %v1244_v59 = vmul.f32 0.01, %v1236_v53  ;;  %v1247_v60 = vsel %vm1239_vm4, %v1235_v49, %v1243_v52 }
 0x154   :  { %v1248_v61 = vsel %vm1240_vm3, %v1236_v53, %v1244_v59  ;;  %v1261_v62 = vrot.slane %v1253_v58, %v1260_v56 }
 0x155   :  { %v1254_v63 = vcombine.low %v1247_v60, %v1248_v61 }
 0x157   :  { %v1268_v0 = vrot.slane %v1254_v63, %v1260_v56 }
 0x159   :  { %v1269_v1 = vcombine.low %v1261_v62, %v1268_v0 }
 0x15b   :  { %1278 = vst.msk [vmem:[%s1629_s3] sm:$0xff] %vm1277_vm9, %v1269_v1 }

// kernel: pallas_forward.4
= control target key start
LH: loop header
LB: loop body
LE: loop exit
PB: predicated region body
PF: predicated region fallthrough
CT: control target
= control target key end

     0   :  { %v129_v0 = vmov 0.0   ;;  %vm130_vm0 = vmmov 0   ;;  %v131_v3 = vmov 0   ;;  %vm25_vm1 = vcmask 261120   ;;  %s173_s0 = inlined_call_operand.vmem [shape: f32[32,108], index: 0, kind: input, shape index: {}]   ;;  %s174_s2 = inlined_call_operand.vmem [shape: f32[4,1], index: 2, kind: input, shape index: {}]   ;;  %s175_s1 = inlined_call_operand.vmem [shape: f32[4,32], index: 1, kind: input, shape index: {}]   ;;  %s176_s3 = inlined_call_operand.vmem [shape: f32[4,108], index: 3, kind: output, shape index: {}]  }
   0x1   :  { %114 = vmatprep.subr.mxu0 %v129_v0  ;;  %v18_v1 = vld [vmem:[%s173_s0 + $0x18] sm:$0xff]  ;;  %v17_v2 = vld [vmem:[%s173_s0 + $0x10] sm:$0xff]  ;;  %122 = vmatprep.mubr.msk.f32.mxu0 %vm130_vm0, %v129_v0  ;;  %v19_v4 = vld [vmem:[%s174_s2] sm:$0xf]  ;;  %vm102_vm3 = vcmask 879616  }
   0x2   :  { %115 = vmatpush3.msra.mxu0 %v18_v1  ;;  %128 = vset.pattern.permute.xlu0 %v131_v3  ;;  %v16_v5 = vld [vmem:[%s173_s0 + $0x8] sm:$0xff]  ;;  %v15_v6 = vld [vmem:[%s173_s0] sm:$0xff] }
   0x3   :  { %116 = vmatprep.subr.mxu0 %v129_v0  ;;  %22 = vperm.xlu0 %128, %v19_v4   ;;  %v14_v7 = vld [vmem:[%s175_s1] sm:$0xf] }
   0x4   :  { %117 = vmatpush3.msra.mxu0 %v17_v2 }
   0x5   :  { %118 = vmatprep.subr.mxu0 %v129_v0 }
   0x6   :  { %119 = vmatpush3.msra.mxu0 %v16_v5 }
   0x7   :  { %120 = vmatprep.subr.mxu0 %v129_v0 }
   0x8   :  { %121 = vmatpush3.msra.mxu0 %v15_v6 }
   0x9   :  { %123 = vmatmul.mubr.msk.f32.vlgmr.msra.gmra.mxu0 %vm25_vm1, %v14_v7 }
  0x7e   :  { %v23_v8 = vpop.permute.xlu0 %22 }
  0xc9   :  { %v95_v9 = vpop.f32.mrf.mxu0 }
  0xca   :  { %v96_v10 = vadd.f32 %v95_v9, %v23_v8 }
  0xcb   :  { %v124_v11 = vpop.f32.mrf.mxu0 }
  0xcc   :  { %vm99_vm2 = vcmp.ge.f32.partialorder %v96_v10, 0.0  ;;  %v100_v12 = vmul.f32 0.01, %v96_v10 }
  0xce   :  { %v101_v13 = vsel %vm99_vm2, %v96_v10, %v100_v12 }
  0xcf   :  { %103 = vst.msk [vmem:[%s176_s3] sm:$0xf] %vm102_vm3, %v101_v13 }

// kernel: pallas_forward.5
= control target key start
LH: loop header
LB: loop body
LE: loop exit
PB: predicated region body
PF: predicated region fallthrough
CT: control target
= control target key end

     0   :  { %s1638_s24 = smov 0   ;;  %s1828_s0 = inlined_call_operand.vmem [shape: f32[4,8,36], index: 0, kind: input, shape index: {}]   ;;  %s1829_s1 = inlined_call_operand.vmem [shape: f32[4,8,16], index: 1, kind: input, shape index: {}]   ;;  %s1830_s2 = inlined_call_operand.vmem [shape: f32[36,8], index: 2, kind: input, shape index: {}]   ;;  %s1831_s3 = inlined_call_operand.vmem [shape: f32[1,8], index: 3, kind: input, shape index: {}]   ;;  %s1832_s4 = inlined_call_operand.vmem [shape: f32[16,96], index: 4, kind: input, shape index: {}]   ;;  %s1833_s5 = inlined_call_operand.vmem [shape: f32[8,96], index: 5, kind: input, shape index: {}]   ;;  %s1834_s6 = inlined_call_operand.vmem [shape: f32[32,96], index: 6, kind: input, shape index: {}]   ;;  %s1835_s7 = inlined_call_operand.vmem [shape: f32[1,96], index: 7, kind: input, shape index: {}]   ;;  %s1836_s8 = inlined_call_operand.vmem [shape: f32[1,96], index: 8, kind: input, shape index: {}]   ;;  %s1837_s9 = inlined_call_operand.vmem [shape: f32[32,32], index: 9, kind: input, shape index: {}]   ;;  %s1838_s10 = inlined_call_operand.vmem [shape: f32[1,32], index: 10, kind: input, shape index: {}]   ;;  %s1839_s11 = inlined_call_operand.vmem [shape: f32[32,32], index: 11, kind: input, shape index: {}]   ;;  %s1840_s12 = inlined_call_operand.vmem [shape: f32[1,32], index: 12, kind: input, shape index: {}]   ;;  %s1841_s13 = inlined_call_operand.vmem [shape: f32[32,32], index: 13, kind: input, shape index: {}]   ;;  %s1842_s14 = inlined_call_operand.vmem [shape: f32[1,32], index: 14, kind: input, shape index: {}]   ;;  %s1843_s15 = inlined_call_operand.vmem [shape: f32[32,20], index: 15, kind: input, shape index: {}]   ;;  %s1844_s16 = inlined_call_operand.vmem [shape: f32[1,20], index: 16, kind: input, shape index: {}]   ;;  %s1845_s17 = inlined_call_operand.vmem [shape: f32[4,8,20], index: 17, kind: output, shape index: {}]  }
   0x1   :  { %1847 = sst [smem:[#allocation4_spill]] %s1828_s0 }
   0x2   :  { %1848 = sst [smem:[#allocation5_spill]] %s1829_s1 }
   0x3 LB: > { %1849 = sst [smem:[#allocation3_spill]] %s1540_s24  ;;  %s1361_s25 = sadd.s32 4294967295, %s1540_s24   ;;  %s1540_s24 = sphi %s1638_s24, %s27_s24  }
   0x4   : > { %p1365_p0 = scmp.ge.s32.totalorder %s1540_s24, 1  ;;  %p495_p1 = scmp.lt.s32.totalorder %s1540_s24, 5 }
   0x6   : > { %p496_p2 = pnand %p1365_p0, %p495_p1 }
   0x7   : > { %p549_p3 = scmp.lt.s32.totalorder (!%p496_p2), %s1361_s25, 3  ;;  %s1850_s0 = sld [smem:[#allocation4_spill]] (!%p496_p2) }
   0x8   : > { %499 = sbr.rel (%p496_p2) target bundleno = 1767 (0x6e7), region = 88  ;;  %s1851_s1 = sld [smem:[#allocation5_spill]] (!%p496_p2) }
   0x9   : > { %p1369_p4 = scmp.ne.s32.totalorder (!%p496_p2), %s1361_s25, 0 }
   0xd   : > { %s550_s26 = scalar_select %p549_p3, %s1361_s25, 3 }
   0xe   : > { %564 = sbr.rel (%p1369_p4) target bundleno = 21 (0x15), region = 92 }
   0xf   : > { %s1646_s27 = sshll.u32 %s550_s26, 3 }
  0x10   : > { %s552_s30 = scalar_lea.vmem %s1850_s0, %s1646_s27  ;;  %s556_s20 = scalar_lea.vmem %s1851_s1, %s1646_s27 }
  0x11   : > { %s560_s23 = scalar_lea.vmem %s1845_s17, %s1646_s27 }
  0x13   : > { %vm565_vm0 = vcmask 261120   ;;  %v1542_v0 = vmov 0.0  }
  0x14   : > { %566 = vst.msk [vmem:[#allocation2] sm:$0xff] %vm565_vm0, %v1542_v0 }
  0x15 PF: > { %v574_v1 = vld [vmem:[%s1830_s2 + $0x20] sm:$0xf]  ;;  %vm586_vm1 = vcmask 1043456   ;;  %v1543_v2 = vmov 0.0   ;;  %v573_v3 = vld [vmem:[%s1830_s2 + $0x18] sm:$0xff]  ;;  %vm1544_vm2 = vmmov 0  }
  0x16   : > { %1428 = vmatprep.subr.mxu0 %v1543_v2  ;;  %1441 = vmatprep.subr.mxu1 %v1543_v2  ;;  %v572_v4 = vld [vmem:[%s1830_s2 + $0x10] sm:$0xff]  ;;  %v571_v5 = vld [vmem:[%s1830_s2 + $0x8] sm:$0xff]  ;;  %v570_v6 = vld [vmem:[%s1830_s2] sm:$0xff]  ;;  %vm582_vm3 = vcmask 293888   ;;  %vm666_vm5 = vcmask 64512   ;;  %vm740_vm6 = vcmask 130048  }
  0x17   : > { %1429 = vmatpush3.msk.msra.mxu0 %vm586_vm1, %v574_v1  ;;  %1438 = vmatprep.mubr.msk.f32.mxu0 %vm1544_vm2, %v1543_v2  ;;  %v567_v7 = vld [vmem:[%s552_s30] sm:$0xff]  ;;  %v664_v14 = vld [vmem:[%s1832_s4 + $0x8] sm:$0xff]  ;;  %v825_v18 = vld [vmem:[%s1834_s6 + $0x18] sm:$0xff]  ;;  %vm833_vm7 = vcmask 261120   ;;  %s1545_s0 = smov 64   ;;  %s1546_s25 = smov 96  }
  0x18   : > { %1430 = vmatprep.subr.mxu0 %v1543_v2  ;;  %1443 = vmatprep.mubr.msk.f32.mxu1 %vm1544_vm2, %v1543_v2  ;;  %v665_v8 = vld [vmem:[%s1833_s5] sm:$0xff]  ;;  %v824_v19 = vld [vmem:[%s1834_s6 + $0x10] sm:$0xff]  ;;  %v823_v20 = vld [vmem:[%s1834_s6 + $0x8] sm:$0xff]  ;;  %s1547_s24 = smov 32   ;;  %vm1294_vm11 = vcmask 162816  }
  0x19   : > { %1431 = vmatpush3.msra.mxu0 %v573_v3  ;;  %1442 = vmatpush3.msra.mxu1 %v665_v8  ;;  %v1370_v9 = vld [vmem:[%s1831_s3] ss:$0 sm:$0xff]  ;;  %v944_v43 = vld [vmem:[%s1837_s9 + $0x18] sm:$0xff]  ;;  %v943_v44 = vld [vmem:[%s1837_s9 + $0x10] sm:$0xff] }
  0x1a   : > { %1432 = vmatprep.subr.mxu0 %v1543_v2  ;;  %1446 = vmatprep.subr.mxu1 %v1543_v2  ;;  %v663_v16 = vld [vmem:[%s1832_s4] sm:$0xff]  ;;  %v942_v45 = vld [vmem:[%s1837_s9 + $0x8] sm:$0xff]  ;;  %v1033_v55 = vld [vmem:[%s1839_s11 + $0x18] sm:$0xff] }
  0x1b   : > { %1433 = vmatpush3.msra.mxu0 %v572_v4  ;;  %v568_v17 = vld [vmem:[%s556_s20] sm:$0xff]  ;;  %v1032_v56 = vld [vmem:[%s1839_s11 + $0x10] sm:$0xff]  ;;  %v1031_v57 = vld [vmem:[%s1839_s11 + $0x8] sm:$0xff] }
  0x1c   : > { %1434 = vmatprep.subr.mxu0 %v1543_v2  ;;  %v822_v21 = vld [vmem:[%s1834_s6] sm:$0xff] }
  0x1d   : > { %1435 = vmatpush3.msra.mxu0 %v571_v5  ;;  %v569_v22 = vld [vmem:[#allocation2] sm:$0xff]  ;;  %v1123_v5 = vld [vmem:[%s1841_s13 + $0x18] sm:$0xff] }
  0x1e   : > { %1436 = vmatprep.subr.mxu0 %v1543_v2  ;;  %v1376_v28 = vld [vmem:[%s1836_s8] ss:$0 sm:$0xff] }
  0x1f   : > { %1437 = vmatpush3.msra.mxu0 %v570_v6  ;;  %v1375_v32 = vld [vmem:[%s1835_s7] ss:$0 sm:$0xff]  ;;  %v1122_v6 = vld [vmem:[%s1841_s13 + $0x10] sm:$0xff] }
  0x20   : > { %1439 = vmatmul.mubr.msk.f32.vlgmr.msra.gmra.mxu0 %vm582_vm3, %v567_v7  ;;  %1464 = vmatprep.subr.mxu0 %v1543_v2  ;;  %v941_v47 = vld [vmem:[%s1837_s9] sm:$0xff]  ;;  %v1121_v7 = vld [vmem:[%s1841_s13 + $0x8] sm:$0xff] }
  0x21   : > { %1472 = vmatprep.mubr.msk.f32.mxu0 %vm1544_vm2, %v1543_v2  ;;  %1465 = vmatpush3.msra.mxu0 %v944_v43  ;;  %v1030_v58 = vld [vmem:[%s1839_s11] sm:$0xff] }
  0x22   : > { %1466 = vmatprep.subr.mxu0 %v1543_v2  ;;  %v1379_v59 = vld [vmem:[%s1838_s10] ss:$0 sm:$0xff] }
  0x23   : > { %1467 = vmatpush3.msra.mxu0 %v943_v44  ;;  %v1120_v8 = vld [vmem:[%s1841_s13] sm:$0xff] }
  0x24   : > { %1468 = vmatprep.subr.mxu0 %v1543_v2 }
  0x25   : > { %1469 = vmatpush3.msra.mxu0 %v942_v45 }
  0x26   : > { %1470 = vmatprep.subr.mxu0 %v1543_v2 }
  0x27   : > { %1471 = vmatpush3.msra.mxu0 %v941_v47 }
  0x28   : > { %1486 = vmatprep.subr.mxu0 %v1543_v2 }
  0xe0   : > { %v656_v10 = vpop.f32.mrf.mxu0 }
  0xe1   : > { %v657_v11 = vadd.f32 %v1370_v9, %v656_v10  ;;  %v1382_v9 = vld [vmem:[%s1840_s12] ss:$0 sm:$0xff] }
  0xe2   : > { %v1440_v12 = vpop.f32.mrf.mxu0 }
  0xe3   : > { %vm660_vm4 = vcmp.ge.f32.partialorder %v657_v11, 0.0  ;;  %v661_v13 = vmul.f32 0.01, %v657_v11 }
  0xe5   : > { %v662_v15 = vsel %vm660_vm4, %v657_v11, %v661_v13 }
  0xe6   : > { %1444 = vmatmul.mubr.msk.f32.vlgmr.msra.gmra.mxu1 %vm666_vm5, %v662_v15 }
  0xe7   : > { %1447 = vmatpush3.msra.mxu1 %v664_v14  ;;  %1450 = vmatprep.mubr.msk.f32.mxu1 %vm1544_vm2, %v1543_v2 }
  0xe8   : > { %1448 = vmatprep.subr.mxu1 %v1543_v2 }
  0xe9   : > { %1449 = vmatpush3.msra.mxu1 %v663_v16 }
  0xea   : > { %1453 = vmatprep.subr.mxu1 %v1543_v2  ;;  %1451 = vmatmul.mubr.msk.f32.vlgmr.msra.gmra.mxu1 %vm740_vm6, %v568_v17 }
  0xeb   : > { %1454 = vmatpush3.msra.mxu1 %v825_v18  ;;  %1461 = vmatprep.mubr.msk.f32.mxu1 %vm1544_vm2, %v1543_v2  ;;  %v1213_v18 = vld [vmem:[%s1843_s15 + $0x18] sm:$0xff] }
  0xec   : > { %1455 = vmatprep.subr.mxu1 %v1543_v2 }
  0xed   : > { %1456 = vmatpush3.msra.mxu1 %v824_v19  ;;  %v1212_v19 = vld [vmem:[%s1843_s15 + $0x10] sm:$0xff] }
  0xee   : > { %1457 = vmatprep.subr.mxu1 %v1543_v2 }
  0xef   : > { %1458 = vmatpush3.msra.mxu1 %v823_v20  ;;  %v1211_v20 = vld [vmem:[%s1843_s15 + $0x8] sm:$0xff] }
  0xf0   : > { %1459 = vmatprep.subr.mxu1 %v1543_v2 }
  0xf1   : > { %1460 = vmatpush3.msra.mxu1 %v822_v21  ;;  %v1210_v21 = vld [vmem:[%s1843_s15] sm:$0xff] }
  0xf2   : > { %1462 = vmatmul.mubr.msk.f32.vlgmr.msra.gmra.mxu1 %vm833_vm7, %v569_v22  ;;  %1475 = vmatprep.subr.mxu1 %v1543_v2 }
  0xf3   : > { %1483 = vmatprep.mubr.msk.f32.mxu1 %vm1544_vm2, %v1543_v2  ;;  %1476 = vmatpush3.msra.mxu1 %v1033_v55 }
  0xf4   : > { %1477 = vmatprep.subr.mxu1 %v1543_v2 }
  0xf5   : > { %1478 = vmatpush3.msra.mxu1 %v1032_v56 }
  0xf6   : > { %1479 = vmatprep.subr.mxu1 %v1543_v2 }
  0xf7   : > { %1480 = vmatpush3.msra.mxu1 %v1031_v57 }
  0xf8   : > { %1481 = vmatprep.subr.mxu1 %v1543_v2 }
  0xf9   : > { %1482 = vmatpush3.msra.mxu1 %v1030_v58 }
  0xfa   : > { %1497 = vmatprep.subr.mxu1 %v1543_v2 }
 0x1a6   : > { %v736_v23 = vpop.f32.mrf.mxu1 }
 0x1a8   : > { %v1445_v24 = vpop.f32.mrf.mxu1 }
 0x1aa   : > { %v810_v25 = vpop.f32.mrf.mxu1 }
 0x1ab   : > { %v811_v26 = vadd.f32 %v810_v25, %v736_v23 }
 0x1ac   : > { %v1452_v27 = vpop.f32.mrf.mxu1 }
 0x1ad   : > { %v821_v33 = vadd.f32 %v1375_v32, %v811_v26 }
 0x1b2   : > { %v903_v29 = vpop.f32.mrf.mxu1 }
 0x1b3   : > { %v904_v30 = vadd.f32 %v1376_v28, %v903_v29 }
 0x1b4   : > { %v1463_v31 = vpop.f32.mrf.mxu1 }
 0x1b5   : > { %915 = vrot.lane.b32.xlu0 %v904_v30, %s1545_s0  ;;  %v907_v34 = vadd.f32 %v904_v30, %v821_v33  ;;  %v1388_v30 = vld [vmem:[%s1844_s16] ss:$0 sm:$0xff] }
 0x1b7   : > { %v1378_v35 = vmul.f32 -1.442695, %v907_v34 }
 0x1b9   : > { %1522 = vpow2.f32 %v1378_v35 }
 0x1c6   : > { %v1523_v36 = vpop.eup %1522 }
 0x1c7   : > { %v911_v37 = vadd.f32 1.0, %v1523_v36 }
 0x1c9   : > { %1524 = vrcp.f32 %v911_v37 }
 0x1d6   : > { %v1525_v38 = vpop.eup %1524 }
 0x1d7   : > { %v925_v49 = vsub.f32 1.0, %v1525_v38 }
 0x227   : > { %v916_v39 = vpop.permute.xlu0 %915 }
 0x228   : > { %v918_v40 = vmul.f32 %v1525_v38, %v916_v39 }
 0x22a   : > { %920 = vrot.lane.b32.xlu0 %v918_v40, %s1545_s0 }
 0x29c   : > { %v921_v41 = vpop.permute.xlu0 %920 }
 0x29d   : > { %v923_v42 = vadd.f32 %v921_v41, %v821_v33 }
 0x29f   : > { %1526 = vtanh.f32 %v923_v42 }
 0x2ac   : > { %v1527_v46 = vpop.eup %1526 }
 0x2ad   : > { %927 = vrot.lane.b32.xlu1 %v1527_v46, %s1546_s25 }
 0x2b1   : > { %931 = vrot.lane.b32.xlu1 %v569_v22, %s1547_s24  ;;  %v1385_v22 = vld [vmem:[%s1842_s14] ss:$0 sm:$0xff] }
 0x31f   : > { %v928_v48 = vpop.permute.xlu1 %927 }
 0x320   : > { %v930_v51 = vmul.f32 %v928_v48, %v925_v49 }
 0x323   : > { %v932_v50 = vpop.permute.xlu1 %931 }
 0x324   : > { %v934_v52 = vmul.f32 %v1525_v38, %v932_v50 }
 0x326   : > { %v935_v53 = vadd.f32 %v934_v52, %v930_v51 }
 0x328   : > { %937 = vrot.lane.b32.xlu0 %v935_v53, %s1546_s25 }
 0x39a   : > { %v938_v54 = vpop.permute.xlu0 %937 }
 0x39b   : > { %940 = vst.msk [vmem:[#allocation2] sm:$0xff] %vm833_vm7, %v938_v54  ;;  %1473 = vmatmul.mubr.msk.f32.vlgmr.msra.gmra.mxu0 %vm833_vm7, %v938_v54 }
 0x39c   : > { %1494 = vmatprep.mubr.msk.f32.mxu0 %vm1544_vm2, %v1543_v2  ;;  %1487 = vmatpush3.msra.mxu0 %v1123_v5 }
 0x39d   : > { %1488 = vmatprep.subr.mxu0 %v1543_v2 }
 0x39e   : > { %1489 = vmatpush3.msra.mxu0 %v1122_v6 }
 0x39f   : > { %1490 = vmatprep.subr.mxu0 %v1543_v2 }
 0x3a0   : > { %1491 = vmatpush3.msra.mxu0 %v1121_v7 }
 0x3a1   : > { %1492 = vmatprep.subr.mxu0 %v1543_v2 }
 0x3a2   : > { %1493 = vmatpush3.msra.mxu0 %v1120_v8 }
 0x45b   : > { %v1020_v60 = vpop.f32.mrf.mxu0 }
 0x45c   : > { %v1021_v61 = vadd.f32 %v1379_v59, %v1020_v60 }
 0x45d   : > { %v1474_v62 = vpop.f32.mrf.mxu0 }
 0x45e   : > { %v1025_v63 = vmin.f32 %v1021_v61, 0.0  ;;  %vm1024_vm8 = vcmp.gt.f32.partialorder %v1021_v61, 0.0 }
 0x460   : > { %v1026_v0 = vmul.f32 1.442695, %v1025_v63 }
 0x462   : > { %1528 = vpow2.f32 %v1026_v0 }
 0x46f   : > { %v1529_v1 = vpop.eup %1528 }
 0x470   : > { %v1381_v3 = vadd.f32 -1.0, %v1529_v1 }
 0x472   : > { %v1029_v4 = vsel %vm1024_vm8, %v1021_v61, %v1381_v3 }
 0x473   : > { %1484 = vmatmul.mubr.msk.f32.vlgmr.msra.gmra.mxu1 %vm833_vm7, %v1029_v4 }
 0x474   : > { %1505 = vmatprep.mubr.msk.f32.mxu1 %vm1544_vm2, %v1543_v2  ;;  %1498 = vmatpush3.msra.mxu1 %v1213_v18 }
 0x475   : > { %1499 = vmatprep.subr.mxu1 %v1543_v2 }
 0x476   : > { %1500 = vmatpush3.msra.mxu1 %v1212_v19 }
 0x477   : > { %1501 = vmatprep.subr.mxu1 %v1543_v2 }
 0x478   : > { %1502 = vmatpush3.msra.mxu1 %v1211_v20 }
 0x479   : > { %1503 = vmatprep.subr.mxu1 %v1543_v2 }
 0x47a   : > { %1504 = vmatpush3.msra.mxu1 %v1210_v21 }
 0x533   : > { %v1110_v10 = vpop.f32.mrf.mxu1 }
 0x534   : > { %v1111_v11 = vadd.f32 %v1382_v9, %v1110_v10 }
 0x535   : > { %v1485_v12 = vpop.f32.mrf.mxu1 }
 0x536   : > { %v1115_v13 = vmin.f32 %v1111_v11, 0.0  ;;  %vm1114_vm9 = vcmp.gt.f32.partialorder %v1111_v11, 0.0 }
 0x538   : > { %v1116_v14 = vmul.f32 1.442695, %v1115_v13 }
 0x53a   : > { %1530 = vpow2.f32 %v1116_v14 }
 0x547   : > { %v1531_v15 = vpop.eup %1530 }
 0x548   : > { %v1384_v16 = vadd.f32 -1.0, %v1531_v15 }
 0x54a   : > { %v1119_v17 = vsel %vm1114_vm9, %v1111_v11, %v1384_v16 }
 0x54b   : > { %1495 = vmatmul.mubr.msk.f32.vlgmr.msra.gmra.mxu0 %vm833_vm7, %v1119_v17 }
 0x60b   : > { %v1200_v23 = vpop.f32.mrf.mxu0 }
 0x60c   : > { %v1201_v24 = vadd.f32 %v1385_v22, %v1200_v23 }
 0x60d   : > { %v1496_v25 = vpop.f32.mrf.mxu0 }
 0x60e   : > { %v1205_v26 = vmin.f32 %v1201_v24, 0.0  ;;  %vm1204_vm10 = vcmp.gt.f32.partialorder %v1201_v24, 0.0 }
 0x610   : > { %v1206_v27 = vmul.f32 1.442695, %v1205_v26 }
 0x612   : > { %1532 = vpow2.f32 %v1206_v27 }
 0x61f   : > { %v1533_v28 = vpop.eup %1532 }
 0x620   : > { %v1387_v29 = vadd.f32 -1.0, %v1533_v28 }
 0x622   : > { %v1209_v2 = vsel %vm1204_vm10, %v1201_v24, %v1387_v29 }
 0x623   : > { %1506 = vmatmul.mubr.msk.f32.vlgmr.msra.gmra.mxu1 %vm833_vm7, %v1209_v2 }
 0x6e3   : > { %v1290_v31 = vpop.f32.mrf.mxu1 }
 0x6e4   : > { %v1291_v32 = vadd.f32 %v1388_v30, %v1290_v31 }
 0x6e5   : > { %v1507_v33 = vpop.f32.mrf.mxu1 }
 0x6e6   : > { %1295 = vst.msk [vmem:[%s560_s23] sm:$0xff] %vm1294_vm11, %v1291_v32 }
 0x6e7 PF: > { %s1853_s30 = sld [smem:[#allocation3_spill]] }
 0x6ed   : > { %s27_s24 = sadd.s32 1, %s1853_s30  }
 0x6ee   : > { %p24_p5 = scmp.ge.s32.totalorder %s27_s24, 6  }
 0x6f0   :  { %26 = sbr.rel (!%p24_p5) target bundleno = 3 (0x3), region = 125 }

</bundles_post_ra>
